<compile_context>
chip_gen: v5e
topology: v5e:2x2
jax: 0.10.0
libtpu: 0.0.40
codegen_flags: <defaults>
</compile_context>

<pallas_src>
import functools
import math

import jax
import jax.numpy as jnp
from jax import lax
from jax.experimental import pallas as pl
from jax.experimental.pallas import tpu as pltpu


# ----------------------------------------------------------------------------
# Hardware-aware knobs
# ----------------------------------------------------------------------------
def _query_vmem_limit():
    """~75% of physical VMEM, capped at 100 MiB (96 MiB on v5e/v6e, 48 MiB v7x)."""
    try:
        phys = int(pltpu.get_tpu_info().vmem_capacity_bytes)
    except Exception:
        phys = 64 * 1024 * 1024        # conservative fallback (v7x per-TC VMEM)
    return min(phys * 3 // 4, 100 * 1024 * 1024)


_VMEM_LIMIT = _query_vmem_limit()


def _probe_single_buffered():
    """True iff pipeline_mode=pl.Buffered(1) compiles, runs and is correct here."""
    def k(x_ref, w_ref, o_ref):
        o_ref[...] = x_ref[...] + w_ref[...]
    try:
        w_spec = pl.BlockSpec((8, 128), lambda i: (0, 0),
                              pipeline_mode=pl.Buffered(buffer_count=1))
        fn = pl.pallas_call(
            k,
            out_shape=jax.ShapeDtypeStruct((16, 128), jnp.float32),
            grid_spec=pltpu.PrefetchScalarGridSpec(
                num_scalar_prefetch=0, grid=(2,),
                in_specs=[pl.BlockSpec((8, 128), lambda i: (i, 0)), w_spec],
                out_specs=pl.BlockSpec((8, 128), lambda i: (i, 0))),
            compiler_params=pltpu.CompilerParams(vmem_limit_bytes=_VMEM_LIMIT),
        )
        out = fn(jnp.ones((16, 128), jnp.float32), jnp.ones((8, 128), jnp.float32))
        jax.block_until_ready(out)
        return bool(jnp.all(out == 2.0))
    except Exception:
        return False


_SINGLE_BUFFER_OK = _probe_single_buffered()


def _round_up(x, m):
    return (x + m - 1) // m * m


def _const_spec(shape):
    """Full-array block, same block every grid step; single-buffered if possible."""
    rank = len(shape)

    def index_map(*_):
        return (0,) * rank

    if _SINGLE_BUFFER_OK:
        return pl.BlockSpec(shape, index_map,
                            pipeline_mode=pl.Buffered(buffer_count=1))
    return pl.BlockSpec(shape, index_map)


# ----------------------------------------------------------------------------
# Kernel 1: fused LSTM layer
#   per grid step (block_t timesteps):
#     xg = (block_t*B, In) @ (In, 4H) + b            -> VMEM scratch (no HBM trip)
#     for t in block_t:  gates = xg[t] + h @ W_hh ;  standard LSTM cell update
# ----------------------------------------------------------------------------
def _lstm_layer_kernel(x_ref, h0_ref, c0_ref, wih_ref, whh_ref, b_ref,
                       out_ref, hN_ref, cN_ref, xg_sc, h_sc, c_sc,
                       *, block_t, b_rows, h_dim):
    s = pl.program_id(0)
    H = h_dim

    @pl.when(s == 0)
    def _():
        h_sc[...] = h0_ref[...]
        c_sc[...] = c0_ref[...]

    # Fused, hoisted input projection for this whole time block (one MXU matmul).
    xg_sc[...] = (jnp.dot(x_ref[...], wih_ref[...],
                          preferred_element_type=jnp.float32) + b_ref[...])

    w_hh = whh_ref[...]                       # (H, 4H) bf16, loaded once per block

    def step(t, carry):
        row = pl.multiple_of(t * b_rows, b_rows)
        gates = xg_sc[pl.ds(row, b_rows), :] + jnp.dot(
            h_sc[...].astype(jnp.bfloat16), w_hh,
            preferred_element_type=jnp.float32)            # (B, 4H) f32
        # PyTorch LSTM gate order along 4H: i, f, g, o.
        i = jax.nn.sigmoid(gates[:, 0:H])
        f = jax.nn.sigmoid(gates[:, H:2 * H])
        g = jnp.tanh(gates[:, 2 * H:3 * H])
        o = jax.nn.sigmoid(gates[:, 3 * H:4 * H])
        c_new = f * c_sc[...] + i * g
        h_new = o * jnp.tanh(c_new)
        h_sc[...] = h_new
        c_sc[...] = c_new
        out_ref[t] = h_new.astype(out_ref.dtype)           # bf16 writeback
        return carry

    # Capped partial unroll: amortize loop overhead without blowing the vreg file.
    lax.fori_loop(0, block_t, step, 0, unroll=min(block_t, 8))

    @pl.when(s == pl.num_programs(0) - 1)
    def _():
        hN_ref[...] = h_sc[...]
        cN_ref[...] = c_sc[...]


def _pick_block_t(T, B, in_sz, H):
    """Largest time block that divides T, keeps sublane-friendly x blocks and
    fits the VMEM budget (x/out double-buffered bf16 + f32 gate scratch)."""
    wbuf = 1 if _SINGLE_BUFFER_OK else 2
    weight_bytes = wbuf * (2 * in_sz * 4 * H + 2 * H * 4 * H + 4 * 4 * H)
    fixed = weight_bytes + 6 * 4 * B * H        # h/c scratch + h0/c0/hN/cN blocks
    budget = max(_VMEM_LIMIT - fixed, 1 << 20)
    per_t = B * (2 * 2 * in_sz + 2 * 2 * H + 4 * 4 * H)
    for c in (32, 16, 8, 4, 2, 1):
        if T % c == 0 and ((c * B) % 8 == 0 or c == T) and c * per_t <= budget:
            return c
    return T


def lstm_layer(x_bf16, h0, c0, w_ih_bf16, w_hh_bf16, b_f32):
    """x_bf16: (T, B, In) bf16; h0, c0: (B, H) f32; w_ih: (In, 4H) bf16;
    w_hh: (H, 4H) bf16; b: (1, 4H) f32 (= b_ih + b_hh).
    Returns (out (T,B,H) bf16, hN (B,H) f32, cN (B,H) f32)."""
    T, B, In = x_bf16.shape
    H = h0.shape[-1]
    four_h = 4 * H
    block_t = _pick_block_t(T, B, In, H)

    # Flat time-major view so the fused projection needs no in-kernel reshape.
    x_flat = x_bf16.reshape(T * B, In)

    kernel = functools.partial(_lstm_layer_kernel, block_t=block_t,
                               b_rows=B, h_dim=H)
    out, hN, cN = pl.pallas_call(
        kernel,
        out_shape=(jax.ShapeDtypeStruct((T, B, H), jnp.bfloat16),
                   jax.ShapeDtypeStruct((B, H), jnp.float32),
                   jax.ShapeDtypeStruct((B, H), jnp.float32)),
        grid_spec=pltpu.PrefetchScalarGridSpec(
            num_scalar_prefetch=0,
            grid=(T // block_t,),
            in_specs=[
                pl.BlockSpec((block_t * B, In), lambda s: (s, 0)),
                _const_spec((B, H)),
                _const_spec((B, H)),
                _const_spec((In, four_h)),
                _const_spec((H, four_h)),
                _const_spec((1, four_h)),
            ],
            out_specs=[
                pl.BlockSpec((block_t, B, H), lambda s: (s, 0, 0)),
                pl.BlockSpec((B, H), lambda s: (0, 0)),
                pl.BlockSpec((B, H), lambda s: (0, 0)),
            ],
            scratch_shapes=[pltpu.VMEM((block_t * B, four_h), jnp.float32),
                            pltpu.VMEM((B, H), jnp.float32),
                            pltpu.VMEM((B, H), jnp.float32)],
        ),
        compiler_params=pltpu.CompilerParams(
            dimension_semantics=("arbitrary",),     # true recurrence => sequential
            vmem_limit_bytes=_VMEM_LIMIT),
    )(x_flat, h0, c0, w_ih_bf16, w_hh_bf16, b_f32)
    return out, hN, cN


# ----------------------------------------------------------------------------
# Kernel 2: Mixture-of-Softmaxes head, row-tiled over N = T*B
#   latent  = tanh(out @ W_trf + b_trf)      (single wide matmul, if needed)
#   prior   = softmax(out @ W_prior)
#   prob_e  = softmax(latent_e @ W_dec + b_dec)
#   logp    = log(sum_e prior_e * prob_e + 1e-8)
# ----------------------------------------------------------------------------
def _mos_head_kernel(*refs, n_experts, ninp, needs_trf):
    if needs_trf:
        (out_ref, wtrf_ref, btrf_ref, wprior_ref, wdec_ref, bdec_ref,
         logp_ref) = refs
    else:
        (out_ref, wprior_ref, wdec_ref, bdec_ref, logp_ref) = refs

    o_bf = out_ref[...].astype(jnp.bfloat16)               # (tile_n, nhidlast)

    # prior = softmax(out @ W_prior)   (bias-free Linear; only E columns)
    prior_logit = jnp.dot(o_bf, wprior_ref[...],
                          preferred_element_type=jnp.float32)
    prior_logit = prior_logit - jnp.max(prior_logit, axis=1, keepdims=True)
    pe = jnp.exp(prior_logit)
    prior = pe / jnp.sum(pe, axis=1, keepdims=True)        # (tile_n, E)

    if needs_trf:
        # All experts' latents in ONE wide matmul.
        lat_all = jnp.tanh(
            jnp.dot(o_bf, wtrf_ref[...], preferred_element_type=jnp.float32)
            + btrf_ref[...]).astype(jnp.bfloat16)          # (tile_n, E*ninp)
    else:
        # Reference skips output_trf when nhidlast == n_experts*ninp.
        lat_all = o_bf                                     # (tile_n, E*ninp)

    w_dec = wdec_ref[...]                                  # (ninp, ntoken) bf16
    # Hoist the (1, ntoken) -> (tile_n, ntoken) bias broadcast out of the loop.
    b_dec = pl.broadcast_to(bdec_ref[...], logp_ref.shape)

    # Accumulate the mixture directly in the output VMEM block.
    logp_ref[...] = jnp.zeros(logp_ref.shape, jnp.float32)
    for e in range(n_experts):                             # static unroll, E small
        lat_e = lat_all[:, e * ninp:(e + 1) * ninp]
        logit = (jnp.dot(lat_e, w_dec, preferred_element_type=jnp.float32)
                 + b_dec)                                  # (tile_n, ntoken)
        logit = logit - jnp.max(logit, axis=1, keepdims=True)
        ez = jnp.exp(logit)
        # Fold softmax denominator and prior weight into a single per-row scale
        # (EUP reciprocal; one multiply instead of divide + multiply per expert).
        scale = prior[:, e:e + 1] * pl.reciprocal(
            jnp.sum(ez, axis=1, keepdims=True), approx=True)
        logp_ref[...] += ez * scale
    logp_ref[...] = jnp.log(logp_ref[...] + 1e-8)


def _mos_tile_n(N, ntoken, n_experts, ninp, nhidlast):
    """Row tile from a per-row VMEM budget (weights + intermediates accounted)."""
    wbuf = 1 if _SINGLE_BUFFER_OK else 2
    weight_bytes = wbuf * (2 * ninp * ntoken + 2 * nhidlast * n_experts * ninp
                           + 2 * nhidlast * n_experts
                           + 4 * ntoken + 4 * n_experts * ninp)
    budget = max(_VMEM_LIMIT - weight_bytes, 1 << 20)
    per_row = (2 * 2 * nhidlast          # bf16 input rows, double-buffered
               + 2 * 4 * ntoken          # f32 logp output, double-buffered
               + 3 * 4 * ntoken          # live logit/ez/b_dec temporaries
               + 4 * n_experts * ninp)   # latents
    tile = 64
    for cand in (512, 256, 128):
        if cand * per_row <= budget:
            tile = cand
            break
    if N <= tile:
        tile = max(_round_up(N, 8), 8)
    return tile


def mos_head(out_flat, w_trf_flat, b_trf_flat, w_prior, w_dec, b_dec,
             *, n_experts, ninp, needs_trf):
    """out_flat: (N, nhidlast) bf16; w_trf_flat: (nhidlast, E*ninp) bf16;
    b_trf_flat: (1, E*ninp) f32; w_prior: (nhidlast, E) bf16;
    w_dec: (ninp, ntoken) bf16 (pre-transposed tied embedding); b_dec: (1, ntoken)."""
    N, nhidlast = out_flat.shape
    ntoken = w_dec.shape[1]
    tile_n = _mos_tile_n(N, ntoken, n_experts, ninp, nhidlast)

    # Ragged N: pad up to the tile multiple (never fall back to one huge block).
    n_pad = _round_up(N, tile_n)
    if n_pad != N:
        out_flat = jnp.concatenate(
            [out_flat, jnp.zeros((n_pad - N, nhidlast), out_flat.dtype)], axis=0)

    kernel = functools.partial(_mos_head_kernel, n_experts=n_experts,
                               ninp=ninp, needs_trf=needs_trf)
    row_spec = pl.BlockSpec((tile_n, nhidlast), lambda i: (i, 0))

    if needs_trf:
        operands = (out_flat, w_trf_flat, b_trf_flat, w_prior, w_dec, b_dec)
        in_specs = [row_spec,
                    _const_spec((nhidlast, n_experts * ninp)),
                    _const_spec((1, n_experts * ninp)),
                    _const_spec((nhidlast, n_experts)),
                    _const_spec((ninp, ntoken)),
                    _const_spec((1, ntoken))]
    else:
        assert nhidlast == n_experts * ninp, (
            "needs_trf=False requires nhidlast == n_experts * ninp")
        operands = (out_flat, w_prior, w_dec, b_dec)
        in_specs = [row_spec,
                    _const_spec((nhidlast, n_experts)),
                    _const_spec((ninp, ntoken)),
                    _const_spec((1, ntoken))]

    logp = pl.pallas_call(
        kernel,
        out_shape=jax.ShapeDtypeStruct((n_pad, ntoken), jnp.float32),
        grid_spec=pltpu.PrefetchScalarGridSpec(
            num_scalar_prefetch=0,
            grid=(n_pad // tile_n,),
            in_specs=in_specs,
            out_specs=pl.BlockSpec((tile_n, ntoken), lambda i: (i, 0)),
        ),
        compiler_params=pltpu.CompilerParams(
            dimension_semantics=("parallel",),      # row tiles shard across TCs
            vmem_limit_bytes=_VMEM_LIMIT),
    )(*operands)
    return logp[:N]


# ----------------------------------------------------------------------------
# Model: parameters + forward
# ----------------------------------------------------------------------------
def init_params(key, *, ntoken, ninp, nhid, nhidlast, nlayers, n_experts):
    keys = jax.random.split(key, 4 + 4 * nlayers)
    k_iter = iter(keys)

    params = {}
    # encoder / tied decoder (SparseEmbedding, blocks=1, density=1.0)
    emb = jax.random.uniform(next(k_iter), (ntoken, ninp), jnp.float32, -0.1, 0.1)
    params['emb'] = emb                                        # f32 gather table
    params['w_dec_t'] = jnp.transpose(emb).astype(jnp.bfloat16)  # tied, once
    params['b_dec'] = jnp.zeros((1, ntoken), jnp.float32)

    # LSTM stack (PyTorch init: U(-1/sqrt(H), 1/sqrt(H)); gate order i,f,g,o)
    params['lstm'] = []
    for l in range(nlayers):
        in_sz = ninp if l == 0 else nhid
        h_sz = nhid if l != nlayers - 1 else nhidlast
        s = 1.0 / math.sqrt(h_sz)
        w_ih = jax.random.uniform(next(k_iter), (in_sz, 4 * h_sz),
                                  jnp.float32, -s, s).astype(jnp.bfloat16)
        w_hh = jax.random.uniform(next(k_iter), (h_sz, 4 * h_sz),
                                  jnp.float32, -s, s).astype(jnp.bfloat16)
        b_ih = jax.random.uniform(next(k_iter), (1, 4 * h_sz), jnp.float32, -s, s)
        b_hh = jax.random.uniform(next(k_iter), (1, 4 * h_sz), jnp.float32, -s, s)
        params['lstm'].append((w_ih, w_hh, b_ih + b_hh))

    # prior: Linear(nhidlast, n_experts, bias=False)
    s = 1.0 / math.sqrt(nhidlast)
    params['w_prior'] = jax.random.uniform(
        next(k_iter), (nhidlast, n_experts), jnp.float32, -s, s).astype(jnp.bfloat16)
    # output_trf: Linear(nhidlast, n_experts * ninp) + Tanh, stored FLAT so the
    # MoS head computes all experts with one wide matmul.
    params['w_trf'] = jax.random.uniform(
        next(k_iter), (nhidlast, n_experts * ninp), jnp.float32, -s, s
    ).astype(jnp.bfloat16)
    params['b_trf'] = jax.random.uniform(
        next(k_iter), (1, n_experts * ninp), jnp.float32, -s, s)
    return params


def init_hidden(bsz, *, nhid, nhidlast, nlayers):
    return [(jnp.zeros((1, bsz, nhid if l != nlayers - 1 else nhidlast),
                       jnp.float32),
             jnp.zeros((1, bsz, nhid if l != nlayers - 1 else nhidlast),
                       jnp.float32))
            for l in range(nlayers)]


def rnn_model_forward(params, tokens, hidden, *, ntoken, ninp, nhid, nhidlast,
                      nlayers, n_experts):
    """tokens: (T, B) int32; hidden: list of (h, c) each (1, B, H)."""
    T, B = tokens.shape
    # encoder: embedding lookup (glue — gather stays in plain JAX)
    emb = jnp.take(params['emb'], tokens, axis=0)              # (T, B, ninp) f32
    raw_output = emb.astype(jnp.bfloat16)                      # activations in bf16

    new_hidden = []
    for l in range(nlayers):
        w_ih, w_hh, b = params['lstm'][l]
        h0 = hidden[l][0][0]
        c0 = hidden[l][1][0]
        raw_output, hN, cN = lstm_layer(raw_output, h0, c0, w_ih, w_hh, b)
        new_hidden.append((hN[None], cN[None]))
        # lockdrop / dropouts between layers are identity in eval mode

    out_flat = raw_output.reshape(T * B, nhidlast)             # (N, nhidlast) bf16

    needs_output_trf = nhidlast != n_experts * ninp
    log_prob = mos_head(out_flat, params['w_trf'], params['b_trf'],
                        params['w_prior'], params['w_dec_t'], params['b_dec'],
                        n_experts=n_experts, ninp=ninp,
                        needs_trf=needs_output_trf)            # (N, ntoken)
    return log_prob.reshape(T, B, ntoken), new_hidden


# ----------------------------------------------------------------------------
# Pure-JAX f32 reference (same bf16-stored weights) for correctness checking.
# ----------------------------------------------------------------------------
def reference_forward(params, tokens, hidden, *, ntoken, ninp, nhid, nhidlast,
                      nlayers, n_experts):
    T, B = tokens.shape
    x = jnp.take(params['emb'], tokens, axis=0)
    new_hidden = []
    for l in range(nlayers):
        w_ih, w_hh, b = params['lstm'][l]
        w_ih = w_ih.astype(jnp.float32)
        w_hh = w_hh.astype(jnp.float32)
        h = hidden[l][0][0]
        c = hidden[l][1][0]
        H = h.shape[-1]
        outs = []
        for t in range(T):
            gates = x[t] @ w_ih + b + h @ w_hh
            i = jax.nn.sigmoid(gates[:, 0:H])
            f = jax.nn.sigmoid(gates[:, H:2 * H])
            g = jnp.tanh(gates[:, 2 * H:3 * H])
            o = jax.nn.sigmoid(gates[:, 3 * H:4 * H])
            c = f * c + i * g
            h = o * jnp.tanh(c)
            outs.append(h)
        x = jnp.stack(outs, axis=0)
        new_hidden.append((h[None], c[None]))
    out = x.reshape(T * B, nhidlast)
    if nhidlast != n_experts * ninp:
        lat_all = jnp.tanh(out @ params['w_trf'].astype(jnp.float32)
                           + params['b_trf'])
    else:
        lat_all = out
    prior = jax.nn.softmax(out @ params['w_prior'].astype(jnp.float32), axis=1)
    w_dec = params['w_dec_t'].astype(jnp.float32)
    mixed = jnp.zeros((T * B, ntoken), jnp.float32)
    for e in range(n_experts):
        lat = lat_all[:, e * ninp:(e + 1) * ninp]
        prob = jax.nn.softmax(lat @ w_dec + params['b_dec'], axis=1)
        mixed = mixed + prob * prior[:, e:e + 1]
    logp = jnp.log(mixed + 1e-8)
    return logp.reshape(T, B, ntoken), new_hidden


# ----------------------------------------------------------------------------
if __name__ == "__main__":
    # Small, forward-consistent config (needs_output_trf=True path).
    ntoken, ninp, nhid, nhidlast, nlayers, n_experts = 64, 32, 32, 32, 2, 4
    T, B = 8, 2

    key = jax.random.PRNGKey(0)
    k_param, k_tok = jax.random.split(key)
    params = init_params(k_param, ntoken=ntoken, ninp=ninp, nhid=nhid,
                         nhidlast=nhidlast, nlayers=nlayers,
                         n_experts=n_experts)
    tokens = jax.random.randint(k_tok, (T, B), 0, ntoken, dtype=jnp.int32)
    hidden = init_hidden(B, nhid=nhid, nhidlast=nhidlast, nlayers=nlayers)

    model_output, new_hidden = rnn_model_forward(
        params, tokens, hidden, ntoken=ntoken, ninp=ninp, nhid=nhid,
        nhidlast=nhidlast, nlayers=nlayers, n_experts=n_experts)

    jax.block_until_ready(model_output)
    for h, c in new_hidden:
        jax.block_until_ready(h)
        jax.block_until_ready(c)

    assert model_output.shape == (T, B, ntoken)
    assert new_hidden[0][0].shape == (1, B, nhid)
    assert new_hidden[-1][0].shape == (1, B, nhidlast)

    # Mixture of softmaxes: probabilities sum to ~1 over the vocab.
    mix_sum = jnp.exp(model_output).sum(-1)
    assert bool(jnp.all(jnp.abs(mix_sum - 1.0) < 5e-3)), float(
        jnp.max(jnp.abs(mix_sum - 1.0)))

    # Compare against a pure-JAX f32 reference using the same bf16 weights.
    ref_out, ref_hidden = reference_forward(
        params, tokens, hidden, ntoken=ntoken, ninp=ninp, nhid=nhid,
        nhidlast=nhidlast, nlayers=nlayers, n_experts=n_experts)
    assert float(jnp.max(jnp.abs(model_output - ref_out))) < 5e-2
    for (h, c), (rh, rc) in zip(new_hidden, ref_hidden):
        assert float(jnp.max(jnp.abs(h - rh))) < 2e-2
        assert float(jnp.max(jnp.abs(c - rc))) < 2e-2

    print("KERNEL_OK")
</pallas_src>

<mosaic_0001>
module attributes {stable_mosaic.version = 11 : i64} {
  func.func @k(%arg0: i32, %arg1: memref<8x128xf32, #tpu.memory_space<vmem>>, %arg2: memref<8x128xf32, #tpu.memory_space<vmem>>, %arg3: memref<8x128xf32, #tpu.memory_space<vmem>>) attributes {dimension_semantics = [#tpu.dimension_semantics<arbitrary>], iteration_bounds = array<i64: 2>, scalar_prefetch = 0 : i64, scratch_operands = 0 : i64, tpu.core_type = #tpu.core_type<tc>, window_params = [{transform_indices = @transform_0, window_bounds = array<i64: 8, 128>}, {pipeline_mode = #tpu.pipeline_mode<synchronous>, transform_indices = @transform_1, window_bounds = array<i64: 8, 128>}, {transform_indices = @transform_2, window_bounds = array<i64: 8, 128>}]} {
    %c0 = arith.constant 0 : index
    %c0_0 = arith.constant 0 : index
    %0 = vector.load %arg1[%c0, %c0_0] : memref<8x128xf32, #tpu.memory_space<vmem>>, vector<8x128xf32>
    %c0_1 = arith.constant 0 : index
    %c0_2 = arith.constant 0 : index
    %1 = vector.load %arg2[%c0_1, %c0_2] : memref<8x128xf32, #tpu.memory_space<vmem>>, vector<8x128xf32>
    %2 = arith.addf %0, %1 : vector<8x128xf32>
    %c0_3 = arith.constant 0 : index
    %c0_4 = arith.constant 0 : index
    %3 = vector.load %arg3[%c0_3, %c0_4] : memref<8x128xf32, #tpu.memory_space<vmem>>, vector<8x128xf32>
    tpu.vector_store %arg3[%c0_3, %c0_4], %2 {strides = array<i32>} : memref<8x128xf32, #tpu.memory_space<vmem>>, vector<8x128xf32>,
    return
  }
  func.func @transform_0(%arg0: i32) -> (i32, i32) {
    %c0_i32 = arith.constant 0 : i32
    %c0_i32_0 = arith.constant 0 : i32
    return %arg0, %c0_i32 : i32, i32
  }
  func.func @transform_1(%arg0: i32) -> (i32, i32) {
    %c0_i32 = arith.constant 0 : i32
    %c0_i32_0 = arith.constant 0 : i32
    %c0_i32_1 = arith.constant 0 : i32
    return %c0_i32, %c0_i32_0 : i32, i32
  }
  func.func @transform_2(%arg0: i32) -> (i32, i32) {
    %c0_i32 = arith.constant 0 : i32
    %c0_i32_0 = arith.constant 0 : i32
    return %arg0, %c0_i32 : i32, i32
  }
}

module attributes {stable_mosaic.version = 11 : i64} {
  func.func @_lstm_layer_kernel(%arg0: i32, %arg1: memref<16x32xbf16, #tpu.memory_space<vmem>>, %arg2: memref<2x32xf32, #tpu.memory_space<vmem>>, %arg3: memref<2x32xf32, #tpu.memory_space<vmem>>, %arg4: memref<32x128xbf16, #tpu.memory_space<vmem>>, %arg5: memref<32x128xbf16, #tpu.memory_space<vmem>>, %arg6: memref<1x128xf32, #tpu.memory_space<vmem>>, %arg7: memref<8x2x32xbf16, #tpu.memory_space<vmem>>, %arg8: memref<2x32xf32, #tpu.memory_space<vmem>>, %arg9: memref<2x32xf32, #tpu.memory_space<vmem>>, %arg10: memref<16x128xf32, #tpu.memory_space<vmem>>, %arg11: memref<2x32xf32, #tpu.memory_space<vmem>>, %arg12: memref<2x32xf32, #tpu.memory_space<vmem>>) attributes {dimension_semantics = [#tpu.dimension_semantics<arbitrary>], iteration_bounds = array<i64: 1>, scalar_prefetch = 0 : i64, scratch_operands = 3 : i64, tpu.core_type = #tpu.core_type<tc>, window_params = [{transform_indices = @transform_0, window_bounds = array<i64: 16, 32>}, {pipeline_mode = #tpu.pipeline_mode<synchronous>, transform_indices = @transform_1, window_bounds = array<i64: 2, 32>}, {pipeline_mode = #tpu.pipeline_mode<synchronous>, transform_indices = @transform_2, window_bounds = array<i64: 2, 32>}, {pipeline_mode = #tpu.pipeline_mode<synchronous>, transform_indices = @transform_3, window_bounds = array<i64: 32, 128>}, {pipeline_mode = #tpu.pipeline_mode<synchronous>, transform_indices = @transform_4, window_bounds = array<i64: 32, 128>}, {pipeline_mode = #tpu.pipeline_mode<synchronous>, transform_indices = @transform_5, window_bounds = array<i64: 1, 128>}, {transform_indices = @transform_6, window_bounds = array<i64: 8, 2, 32>}, {pipeline_mode = #tpu.pipeline_mode<synchronous>, transform_indices = @transform_7, window_bounds = array<i64: 2, 32>}, {pipeline_mode = #tpu.pipeline_mode<synchronous>, transform_indices = @transform_8, window_bounds = array<i64: 2, 32>}]} {
    %c0_i32 = arith.constant 0 : i32
    %0 = arith.cmpi eq, %arg0, %c0_i32 : i32
    %1 = arith.extui %0 : i1 to i32
    %c0_i32_0 = arith.constant 0 : i32
    %2 = arith.cmpi ne, %1, %c0_i32_0 : i32
    scf.if %2 {
      %c0_141 = arith.constant 0 : index
      %c0_142 = arith.constant 0 : index
      %342 = vector.load %arg2[%c0_141, %c0_142] : memref<2x32xf32, #tpu.memory_space<vmem>>, vector<2x32xf32>
      %c0_143 = arith.constant 0 : index
      %c0_144 = arith.constant 0 : index
      %343 = vector.load %arg11[%c0_143, %c0_144] : memref<2x32xf32, #tpu.memory_space<vmem>>, vector<2x32xf32>
      tpu.vector_store %arg11[%c0_143, %c0_144], %342 {strides = array<i32>} : memref<2x32xf32, #tpu.memory_space<vmem>>, vector<2x32xf32>,
      %c0_145 = arith.constant 0 : index
      %c0_146 = arith.constant 0 : index
      %344 = vector.load %arg3[%c0_145, %c0_146] : memref<2x32xf32, #tpu.memory_space<vmem>>, vector<2x32xf32>
      %c0_147 = arith.constant 0 : index
      %c0_148 = arith.constant 0 : index
      %345 = vector.load %arg12[%c0_147, %c0_148] : memref<2x32xf32, #tpu.memory_space<vmem>>, vector<2x32xf32>
      tpu.vector_store %arg12[%c0_147, %c0_148], %344 {strides = array<i32>} : memref<2x32xf32, #tpu.memory_space<vmem>>, vector<2x32xf32>,
    } else {
    }
    %c0 = arith.constant 0 : index
    %c0_1 = arith.constant 0 : index
    %3 = vector.load %arg1[%c0, %c0_1] : memref<16x32xbf16, #tpu.memory_space<vmem>>, vector<16x32xbf16>
    %c0_2 = arith.constant 0 : index
    %c0_3 = arith.constant 0 : index
    %4 = vector.load %arg4[%c0_2, %c0_3] : memref<32x128xbf16, #tpu.memory_space<vmem>>, vector<32x128xbf16>
    %cst = arith.constant dense<0.000000e+00> : vector<16x128xf32>
    %5 = tpu.matmul %3, %4, %cst {dimension_numbers = #tpu.dot_dimension_numbers<[1], [0], [0], [1], [0, 0, 1, 1], [], []>} : vector<16x32xbf16>, vector<32x128xbf16>, vector<16x128xf32> -> vector<16x128xf32>
    %c0_4 = arith.constant 0 : index
    %c0_5 = arith.constant 0 : index
    %6 = vector.load %arg6[%c0_4, %c0_5] : memref<1x128xf32, #tpu.memory_space<vmem>>, vector<1x128xf32>
    %7 = vector.broadcast %6 : vector<1x128xf32> to vector<16x128xf32>
    %8 = arith.addf %5, %7 : vector<16x128xf32>
    %c0_6 = arith.constant 0 : index
    %c0_7 = arith.constant 0 : index
    %9 = vector.load %arg10[%c0_6, %c0_7] : memref<16x128xf32, #tpu.memory_space<vmem>>, vector<16x128xf32>
    tpu.vector_store %arg10[%c0_6, %c0_7], %8 {strides = array<i32>} : memref<16x128xf32, #tpu.memory_space<vmem>>, vector<16x128xf32>,
    %c0_8 = arith.constant 0 : index
    %c0_9 = arith.constant 0 : index
    %10 = vector.load %arg5[%c0_8, %c0_9] : memref<32x128xbf16, #tpu.memory_space<vmem>>, vector<32x128xbf16>
    %c0_i32_10 = arith.constant 0 : i32
    %c2_i32 = arith.constant 2 : i32
    %11 = arith.muli %c0_i32_10, %c2_i32 : i32
    %12 = tpu.assume_multiple %11, 2 : i32
    %13 = arith.index_cast %12 : i32 to index
    %c0_11 = arith.constant 0 : index
    %14 = vector.load %arg10[%13, %c0_11] : memref<16x128xf32, #tpu.memory_space<vmem>>, vector<2x128xf32>
    %c0_12 = arith.constant 0 : index
    %c0_13 = arith.constant 0 : index
    %15 = vector.load %arg11[%c0_12, %c0_13] : memref<2x32xf32, #tpu.memory_space<vmem>>, vector<2x32xf32>
    %16 = arith.truncf %15 : vector<2x32xf32> to vector<2x32xbf16>
    %cst_14 = arith.constant dense<0.000000e+00> : vector<2x128xf32>
    %17 = tpu.matmul %16, %10, %cst_14 {dimension_numbers = #tpu.dot_dimension_numbers<[1], [0], [0], [1], [0, 0, 1, 1], [], []>} : vector<2x32xbf16>, vector<32x128xbf16>, vector<2x128xf32> -> vector<2x128xf32>
    %18 = arith.addf %14, %17 : vector<2x128xf32>
    %19 = vector.extract_strided_slice %18 {offsets = [0, 0], sizes = [2, 32], strides = [1, 1]} : vector<2x128xf32> to vector<2x32xf32>
    %20 = arith.negf %19 : vector<2x32xf32>
    %21 = math.exp %20 : vector<2x32xf32>
    %cst_15 = arith.constant 1.000000e+00 : f32
    %22 = vector.broadcast %cst_15 : f32 to vector<2x32xf32>
    %23 = arith.addf %22, %21 : vector<2x32xf32>
    %24 = arith.divf %22, %23 : vector<2x32xf32>
    %25 = vector.extract_strided_slice %18 {offsets = [0, 32], sizes = [2, 32], strides = [1, 1]} : vector<2x128xf32> to vector<2x32xf32>
    %26 = arith.negf %25 : vector<2x32xf32>
    %27 = math.exp %26 : vector<2x32xf32>
    %cst_16 = arith.constant 1.000000e+00 : f32
    %28 = vector.broadcast %cst_16 : f32 to vector<2x32xf32>
    %29 = arith.addf %28, %27 : vector<2x32xf32>
    %30 = arith.divf %28, %29 : vector<2x32xf32>
    %31 = vector.extract_strided_slice %18 {offsets = [0, 64], sizes = [2, 32], strides = [1, 1]} : vector<2x128xf32> to vector<2x32xf32>
    %32 = math.tanh %31 : vector<2x32xf32>
    %33 = vector.extract_strided_slice %18 {offsets = [0, 96], sizes = [2, 32], strides = [1, 1]} : vector<2x128xf32> to vector<2x32xf32>
    %34 = arith.negf %33 : vector<2x32xf32>
    %35 = math.exp %34 : vector<2x32xf32>
    %cst_17 = arith.constant 1.000000e+00 : f32
    %36 = vector.broadcast %cst_17 : f32 to vector<2x32xf32>
    %37 = arith.addf %36, %35 : vector<2x32xf32>
    %38 = arith.divf %36, %37 : vector<2x32xf32>
    %c0_18 = arith.constant 0 : index
    %c0_19 = arith.constant 0 : index
    %39 = vector.load %arg12[%c0_18, %c0_19] : memref<2x32xf32, #tpu.memory_space<vmem>>, vector<2x32xf32>
    %40 = arith.mulf %30, %39 : vector<2x32xf32>
    %41 = arith.mulf %24, %32 : vector<2x32xf32>
    %42 = arith.addf %40, %41 : vector<2x32xf32>
    %43 = math.tanh %42 : vector<2x32xf32>
    %44 = arith.mulf %38, %43 : vector<2x32xf32>
    %c0_20 = arith.constant 0 : index
    %c0_21 = arith.constant 0 : index
    %45 = vector.load %arg11[%c0_20, %c0_21] : memref<2x32xf32, #tpu.memory_space<vmem>>, vector<2x32xf32>
    tpu.vector_store %arg11[%c0_20, %c0_21], %44 {strides = array<i32>} : memref<2x32xf32, #tpu.memory_space<vmem>>, vector<2x32xf32>,
    %c0_22 = arith.constant 0 : index
    %c0_23 = arith.constant 0 : index
    %46 = vector.load %arg12[%c0_22, %c0_23] : memref<2x32xf32, #tpu.memory_space<vmem>>, vector<2x32xf32>
    tpu.vector_store %arg12[%c0_22, %c0_23], %42 {strides = array<i32>} : memref<2x32xf32, #tpu.memory_space<vmem>>, vector<2x32xf32>,
    %47 = arith.truncf %44 : vector<2x32xf32> to vector<2x32xbf16>
    %48 = arith.index_cast %c0_i32_10 : i32 to index
    %c0_24 = arith.constant 0 : index
    %c0_25 = arith.constant 0 : index
    %49 = vector.load %arg7[%48, %c0_24, %c0_25] : memref<8x2x32xbf16, #tpu.memory_space<vmem>>, vector<1x2x32xbf16>
    %50 = vector.shape_cast %49 : vector<1x2x32xbf16> to vector<2x32xbf16>
    %51 = vector.shape_cast %47 : vector<2x32xbf16> to vector<1x2x32xbf16>
    tpu.vector_store %arg7[%48, %c0_24, %c0_25], %51 {strides = array<i32>} : memref<8x2x32xbf16, #tpu.memory_space<vmem>>, vector<1x2x32xbf16>,
    %c1_i32 = arith.constant 1 : i32
    %c2_i32_26 = arith.constant 2 : i32
    %52 = arith.muli %c1_i32, %c2_i32_26 : i32
    %53 = tpu.assume_multiple %52, 2 : i32
    %54 = arith.index_cast %53 : i32 to index
    %c0_27 = arith.constant 0 : index
    %55 = vector.load %arg10[%54, %c0_27] : memref<16x128xf32, #tpu.memory_space<vmem>>, vector<2x128xf32>
    %c0_28 = arith.constant 0 : index
    %c0_29 = arith.constant 0 : index
    %56 = vector.load %arg11[%c0_28, %c0_29] : memref<2x32xf32, #tpu.memory_space<vmem>>, vector<2x32xf32>
    %57 = arith.truncf %56 : vector<2x32xf32> to vector<2x32xbf16>
    %cst_30 = arith.constant dense<0.000000e+00> : vector<2x128xf32>
    %58 = tpu.matmul %57, %10, %cst_30 {dimension_numbers = #tpu.dot_dimension_numbers<[1], [0], [0], [1], [0, 0, 1, 1], [], []>} : vector<2x32xbf16>, vector<32x128xbf16>, vector<2x128xf32> -> vector<2x128xf32>
    %59 = arith.addf %55, %58 : vector<2x128xf32>
    %60 = vector.extract_strided_slice %59 {offsets = [0, 0], sizes = [2, 32], strides = [1, 1]} : vector<2x128xf32> to vector<2x32xf32>
    %61 = arith.negf %60 : vector<2x32xf32>
    %62 = math.exp %61 : vector<2x32xf32>
    %cst_31 = arith.constant 1.000000e+00 : f32
    %63 = vector.broadcast %cst_31 : f32 to vector<2x32xf32>
    %64 = arith.addf %63, %62 : vector<2x32xf32>
    %65 = arith.divf %63, %64 : vector<2x32xf32>
    %66 = vector.extract_strided_slice %59 {offsets = [0, 32], sizes = [2, 32], strides = [1, 1]} : vector<2x128xf32> to vector<2x32xf32>
    %67 = arith.negf %66 : vector<2x32xf32>
    %68 = math.exp %67 : vector<2x32xf32>
    %cst_32 = arith.constant 1.000000e+00 : f32
    %69 = vector.broadcast %cst_32 : f32 to vector<2x32xf32>
    %70 = arith.addf %69, %68 : vector<2x32xf32>
    %71 = arith.divf %69, %70 : vector<2x32xf32>
    %72 = vector.extract_strided_slice %59 {offsets = [0, 64], sizes = [2, 32], strides = [1, 1]} : vector<2x128xf32> to vector<2x32xf32>
    %73 = math.tanh %72 : vector<2x32xf32>
    %74 = vector.extract_strided_slice %59 {offsets = [0, 96], sizes = [2, 32], strides = [1, 1]} : vector<2x128xf32> to vector<2x32xf32>
    %75 = arith.negf %74 : vector<2x32xf32>
    %76 = math.exp %75 : vector<2x32xf32>
    %cst_33 = arith.constant 1.000000e+00 : f32
    %77 = vector.broadcast %cst_33 : f32 to vector<2x32xf32>
    %78 = arith.addf %77, %76 : vector<2x32xf32>
    %79 = arith.divf %77, %78 : vector<2x32xf32>
    %c0_34 = arith.constant 0 : index
    %c0_35 = arith.constant 0 : index
    %80 = vector.load %arg12[%c0_34, %c0_35] : memref<2x32xf32, #tpu.memory_space<vmem>>, vector<2x32xf32>
    %81 = arith.mulf %71, %80 : vector<2x32xf32>
    %82 = arith.mulf %65, %73 : vector<2x32xf32>
    %83 = arith.addf %81, %82 : vector<2x32xf32>
    %84 = math.tanh %83 : vector<2x32xf32>
    %85 = arith.mulf %79, %84 : vector<2x32xf32>
    %c0_36 = arith.constant 0 : index
    %c0_37 = arith.constant 0 : index
    %86 = vector.load %arg11[%c0_36, %c0_37] : memref<2x32xf32, #tpu.memory_space<vmem>>, vector<2x32xf32>
    tpu.vector_store %arg11[%c0_36, %c0_37], %85 {strides = array<i32>} : memref<2x32xf32, #tpu.memory_space<vmem>>, vector<2x32xf32>,
    %c0_38 = arith.constant 0 : index
    %c0_39 = arith.constant 0 : index
    %87 = vector.load %arg12[%c0_38, %c0_39] : memref<2x32xf32, #tpu.memory_space<vmem>>, vector<2x32xf32>
    tpu.vector_store %arg12[%c0_38, %c0_39], %83 {strides = array<i32>} : memref<2x32xf32, #tpu.memory_space<vmem>>, vector<2x32xf32>,
    %88 = arith.truncf %85 : vector<2x32xf32> to vector<2x32xbf16>
    %89 = arith.index_cast %c1_i32 : i32 to index
    %c0_40 = arith.constant 0 : index
    %c0_41 = arith.constant 0 : index
    %90 = vector.load %arg7[%89, %c0_40, %c0_41] : memref<8x2x32xbf16, #tpu.memory_space<vmem>>, vector<1x2x32xbf16>
    %91 = vector.shape_cast %90 : vector<1x2x32xbf16> to vector<2x32xbf16>
    %92 = vector.shape_cast %88 : vector<2x32xbf16> to vector<1x2x32xbf16>
    tpu.vector_store %arg7[%89, %c0_40, %c0_41], %92 {strides = array<i32>} : memref<8x2x32xbf16, #tpu.memory_space<vmem>>, vector<1x2x32xbf16>,
    %c2_i32_42 = arith.constant 2 : i32
    %c2_i32_43 = arith.constant 2 : i32
    %93 = arith.muli %c2_i32_42, %c2_i32_43 : i32
    %94 = tpu.assume_multiple %93, 2 : i32
    %95 = arith.index_cast %94 : i32 to index
    %c0_44 = arith.constant 0 : index
    %96 = vector.load %arg10[%95, %c0_44] : memref<16x128xf32, #tpu.memory_space<vmem>>, vector<2x128xf32>
    %c0_45 = arith.constant 0 : index
    %c0_46 = arith.constant 0 : index
    %97 = vector.load %arg11[%c0_45, %c0_46] : memref<2x32xf32, #tpu.memory_space<vmem>>, vector<2x32xf32>
    %98 = arith.truncf %97 : vector<2x32xf32> to vector<2x32xbf16>
    %cst_47 = arith.constant dense<0.000000e+00> : vector<2x128xf32>
    %99 = tpu.matmul %98, %10, %cst_47 {dimension_numbers = #tpu.dot_dimension_numbers<[1], [0], [0], [1], [0, 0, 1, 1], [], []>} : vector<2x32xbf16>, vector<32x128xbf16>, vector<2x128xf32> -> vector<2x128xf32>
    %100 = arith.addf %96, %99 : vector<2x128xf32>
    %101 = vector.extract_strided_slice %100 {offsets = [0, 0], sizes = [2, 32], strides = [1, 1]} : vector<2x128xf32> to vector<2x32xf32>
    %102 = arith.negf %101 : vector<2x32xf32>
    %103 = math.exp %102 : vector<2x32xf32>
    %cst_48 = arith.constant 1.000000e+00 : f32
    %104 = vector.broadcast %cst_48 : f32 to vector<2x32xf32>
    %105 = arith.addf %104, %103 : vector<2x32xf32>
    %106 = arith.divf %104, %105 : vector<2x32xf32>
    %107 = vector.extract_strided_slice %100 {offsets = [0, 32], sizes = [2, 32], strides = [1, 1]} : vector<2x128xf32> to vector<2x32xf32>
    %108 = arith.negf %107 : vector<2x32xf32>
    %109 = math.exp %108 : vector<2x32xf32>
    %cst_49 = arith.constant 1.000000e+00 : f32
    %110 = vector.broadcast %cst_49 : f32 to vector<2x32xf32>
    %111 = arith.addf %110, %109 : vector<2x32xf32>
    %112 = arith.divf %110, %111 : vector<2x32xf32>
    %113 = vector.extract_strided_slice %100 {offsets = [0, 64], sizes = [2, 32], strides = [1, 1]} : vector<2x128xf32> to vector<2x32xf32>
    %114 = math.tanh %113 : vector<2x32xf32>
    %115 = vector.extract_strided_slice %100 {offsets = [0, 96], sizes = [2, 32], strides = [1, 1]} : vector<2x128xf32> to vector<2x32xf32>
    %116 = arith.negf %115 : vector<2x32xf32>
    %117 = math.exp %116 : vector<2x32xf32>
    %cst_50 = arith.constant 1.000000e+00 : f32
    %118 = vector.broadcast %cst_50 : f32 to vector<2x32xf32>
    %119 = arith.addf %118, %117 : vector<2x32xf32>
    %120 = arith.divf %118, %119 : vector<2x32xf32>
    %c0_51 = arith.constant 0 : index
    %c0_52 = arith.constant 0 : index
    %121 = vector.load %arg12[%c0_51, %c0_52] : memref<2x32xf32, #tpu.memory_space<vmem>>, vector<2x32xf32>
    %122 = arith.mulf %112, %121 : vector<2x32xf32>
    %123 = arith.mulf %106, %114 : vector<2x32xf32>
    %124 = arith.addf %122, %123 : vector<2x32xf32>
    %125 = math.tanh %124 : vector<2x32xf32>
    %126 = arith.mulf %120, %125 : vector<2x32xf32>
    %c0_53 = arith.constant 0 : index
    %c0_54 = arith.constant 0 : index
    %127 = vector.load %arg11[%c0_53, %c0_54] : memref<2x32xf32, #tpu.memory_space<vmem>>, vector<2x32xf32>
    tpu.vector_store %arg11[%c0_53, %c0_54], %126 {strides = array<i32>} : memref<2x32xf32, #tpu.memory_space<vmem>>, vector<2x32xf32>,
    %c0_55 = arith.constant 0 : index
    %c0_56 = arith.constant 0 : index
    %128 = vector.load %arg12[%c0_55, %c0_56] : memref<2x32xf32, #tpu.memory_space<vmem>>, vector<2x32xf32>
    tpu.vector_store %arg12[%c0_55, %c0_56], %124 {strides = array<i32>} : memref<2x32xf32, #tpu.memory_space<vmem>>, vector<2x32xf32>,
    %129 = arith.truncf %126 : vector<2x32xf32> to vector<2x32xbf16>
    %130 = arith.index_cast %c2_i32_42 : i32 to index
    %c0_57 = arith.constant 0 : index
    %c0_58 = arith.constant 0 : index
    %131 = vector.load %arg7[%130, %c0_57, %c0_58] : memref<8x2x32xbf16, #tpu.memory_space<vmem>>, vector<1x2x32xbf16>
    %132 = vector.shape_cast %131 : vector<1x2x32xbf16> to vector<2x32xbf16>
    %133 = vector.shape_cast %129 : vector<2x32xbf16> to vector<1x2x32xbf16>
    tpu.vector_store %arg7[%130, %c0_57, %c0_58], %133 {strides = array<i32>} : memref<8x2x32xbf16, #tpu.memory_space<vmem>>, vector<1x2x32xbf16>,
    %c3_i32 = arith.constant 3 : i32
    %c2_i32_59 = arith.constant 2 : i32
    %134 = arith.muli %c3_i32, %c2_i32_59 : i32
    %135 = tpu.assume_multiple %134, 2 : i32
    %136 = arith.index_cast %135 : i32 to index
    %c0_60 = arith.constant 0 : index
    %137 = vector.load %arg10[%136, %c0_60] : memref<16x128xf32, #tpu.memory_space<vmem>>, vector<2x128xf32>
    %c0_61 = arith.constant 0 : index
    %c0_62 = arith.constant 0 : index
    %138 = vector.load %arg11[%c0_61, %c0_62] : memref<2x32xf32, #tpu.memory_space<vmem>>, vector<2x32xf32>
    %139 = arith.truncf %138 : vector<2x32xf32> to vector<2x32xbf16>
    %cst_63 = arith.constant dense<0.000000e+00> : vector<2x128xf32>
    %140 = tpu.matmul %139, %10, %cst_63 {dimension_numbers = #tpu.dot_dimension_numbers<[1], [0], [0], [1], [0, 0, 1, 1], [], []>} : vector<2x32xbf16>, vector<32x128xbf16>, vector<2x128xf32> -> vector<2x128xf32>
    %141 = arith.addf %137, %140 : vector<2x128xf32>
    %142 = vector.extract_strided_slice %141 {offsets = [0, 0], sizes = [2, 32], strides = [1, 1]} : vector<2x128xf32> to vector<2x32xf32>
    %143 = arith.negf %142 : vector<2x32xf32>
    %144 = math.exp %143 : vector<2x32xf32>
    %cst_64 = arith.constant 1.000000e+00 : f32
    %145 = vector.broadcast %cst_64 : f32 to vector<2x32xf32>
    %146 = arith.addf %145, %144 : vector<2x32xf32>
    %147 = arith.divf %145, %146 : vector<2x32xf32>
    %148 = vector.extract_strided_slice %141 {offsets = [0, 32], sizes = [2, 32], strides = [1, 1]} : vector<2x128xf32> to vector<2x32xf32>
    %149 = arith.negf %148 : vector<2x32xf32>
    %150 = math.exp %149 : vector<2x32xf32>
    %cst_65 = arith.constant 1.000000e+00 : f32
    %151 = vector.broadcast %cst_65 : f32 to vector<2x32xf32>
    %152 = arith.addf %151, %150 : vector<2x32xf32>
    %153 = arith.divf %151, %152 : vector<2x32xf32>
    %154 = vector.extract_strided_slice %141 {offsets = [0, 64], sizes = [2, 32], strides = [1, 1]} : vector<2x128xf32> to vector<2x32xf32>
    %155 = math.tanh %154 : vector<2x32xf32>
    %156 = vector.extract_strided_slice %141 {offsets = [0, 96], sizes = [2, 32], strides = [1, 1]} : vector<2x128xf32> to vector<2x32xf32>
    %157 = arith.negf %156 : vector<2x32xf32>
    %158 = math.exp %157 : vector<2x32xf32>
    %cst_66 = arith.constant 1.000000e+00 : f32
    %159 = vector.broadcast %cst_66 : f32 to vector<2x32xf32>
    %160 = arith.addf %159, %158 : vector<2x32xf32>
    %161 = arith.divf %159, %160 : vector<2x32xf32>
    %c0_67 = arith.constant 0 : index
    %c0_68 = arith.constant 0 : index
    %162 = vector.load %arg12[%c0_67, %c0_68] : memref<2x32xf32, #tpu.memory_space<vmem>>, vector<2x32xf32>
    %163 = arith.mulf %153, %162 : vector<2x32xf32>
    %164 = arith.mulf %147, %155 : vector<2x32xf32>
    %165 = arith.addf %163, %164 : vector<2x32xf32>
    %166 = math.tanh %165 : vector<2x32xf32>
    %167 = arith.mulf %161, %166 : vector<2x32xf32>
    %c0_69 = arith.constant 0 : index
    %c0_70 = arith.constant 0 : index
    %168 = vector.load %arg11[%c0_69, %c0_70] : memref<2x32xf32, #tpu.memory_space<vmem>>, vector<2x32xf32>
    tpu.vector_store %arg11[%c0_69, %c0_70], %167 {strides = array<i32>} : memref<2x32xf32, #tpu.memory_space<vmem>>, vector<2x32xf32>,
    %c0_71 = arith.constant 0 : index
    %c0_72 = arith.constant 0 : index
    %169 = vector.load %arg12[%c0_71, %c0_72] : memref<2x32xf32, #tpu.memory_space<vmem>>, vector<2x32xf32>
    tpu.vector_store %arg12[%c0_71, %c0_72], %165 {strides = array<i32>} : memref<2x32xf32, #tpu.memory_space<vmem>>, vector<2x32xf32>,
    %170 = arith.truncf %167 : vector<2x32xf32> to vector<2x32xbf16>
    %171 = arith.index_cast %c3_i32 : i32 to index
    %c0_73 = arith.constant 0 : index
    %c0_74 = arith.constant 0 : index
    %172 = vector.load %arg7[%171, %c0_73, %c0_74] : memref<8x2x32xbf16, #tpu.memory_space<vmem>>, vector<1x2x32xbf16>
    %173 = vector.shape_cast %172 : vector<1x2x32xbf16> to vector<2x32xbf16>
    %174 = vector.shape_cast %170 : vector<2x32xbf16> to vector<1x2x32xbf16>
    tpu.vector_store %arg7[%171, %c0_73, %c0_74], %174 {strides = array<i32>} : memref<8x2x32xbf16, #tpu.memory_space<vmem>>, vector<1x2x32xbf16>,
    %c4_i32 = arith.constant 4 : i32
    %c2_i32_75 = arith.constant 2 : i32
    %175 = arith.muli %c4_i32, %c2_i32_75 : i32
    %176 = tpu.assume_multiple %175, 2 : i32
    %177 = arith.index_cast %176 : i32 to index
    %c0_76 = arith.constant 0 : index
    %178 = vector.load %arg10[%177, %c0_76] : memref<16x128xf32, #tpu.memory_space<vmem>>, vector<2x128xf32>
    %c0_77 = arith.constant 0 : index
    %c0_78 = arith.constant 0 : index
    %179 = vector.load %arg11[%c0_77, %c0_78] : memref<2x32xf32, #tpu.memory_space<vmem>>, vector<2x32xf32>
    %180 = arith.truncf %179 : vector<2x32xf32> to vector<2x32xbf16>
    %cst_79 = arith.constant dense<0.000000e+00> : vector<2x128xf32>
    %181 = tpu.matmul %180, %10, %cst_79 {dimension_numbers = #tpu.dot_dimension_numbers<[1], [0], [0], [1], [0, 0, 1, 1], [], []>} : vector<2x32xbf16>, vector<32x128xbf16>, vector<2x128xf32> -> vector<2x128xf32>
    %182 = arith.addf %178, %181 : vector<2x128xf32>
    %183 = vector.extract_strided_slice %182 {offsets = [0, 0], sizes = [2, 32], strides = [1, 1]} : vector<2x128xf32> to vector<2x32xf32>
    %184 = arith.negf %183 : vector<2x32xf32>
    %185 = math.exp %184 : vector<2x32xf32>
    %cst_80 = arith.constant 1.000000e+00 : f32
    %186 = vector.broadcast %cst_80 : f32 to vector<2x32xf32>
    %187 = arith.addf %186, %185 : vector<2x32xf32>
    %188 = arith.divf %186, %187 : vector<2x32xf32>
    %189 = vector.extract_strided_slice %182 {offsets = [0, 32], sizes = [2, 32], strides = [1, 1]} : vector<2x128xf32> to vector<2x32xf32>
    %190 = arith.negf %189 : vector<2x32xf32>
    %191 = math.exp %190 : vector<2x32xf32>
    %cst_81 = arith.constant 1.000000e+00 : f32
    %192 = vector.broadcast %cst_81 : f32 to vector<2x32xf32>
    %193 = arith.addf %192, %191 : vector<2x32xf32>
    %194 = arith.divf %192, %193 : vector<2x32xf32>
    %195 = vector.extract_strided_slice %182 {offsets = [0, 64], sizes = [2, 32], strides = [1, 1]} : vector<2x128xf32> to vector<2x32xf32>
    %196 = math.tanh %195 : vector<2x32xf32>
    %197 = vector.extract_strided_slice %182 {offsets = [0, 96], sizes = [2, 32], strides = [1, 1]} : vector<2x128xf32> to vector<2x32xf32>
    %198 = arith.negf %197 : vector<2x32xf32>
    %199 = math.exp %198 : vector<2x32xf32>
    %cst_82 = arith.constant 1.000000e+00 : f32
    %200 = vector.broadcast %cst_82 : f32 to vector<2x32xf32>
    %201 = arith.addf %200, %199 : vector<2x32xf32>
    %202 = arith.divf %200, %201 : vector<2x32xf32>
    %c0_83 = arith.constant 0 : index
    %c0_84 = arith.constant 0 : index
    %203 = vector.load %arg12[%c0_83, %c0_84] : memref<2x32xf32, #tpu.memory_space<vmem>>, vector<2x32xf32>
    %204 = arith.mulf %194, %203 : vector<2x32xf32>
    %205 = arith.mulf %188, %196 : vector<2x32xf32>
    %206 = arith.addf %204, %205 : vector<2x32xf32>
    %207 = math.tanh %206 : vector<2x32xf32>
    %208 = arith.mulf %202, %207 : vector<2x32xf32>
    %c0_85 = arith.constant 0 : index
    %c0_86 = arith.constant 0 : index
    %209 = vector.load %arg11[%c0_85, %c0_86] : memref<2x32xf32, #tpu.memory_space<vmem>>, vector<2x32xf32>
    tpu.vector_store %arg11[%c0_85, %c0_86], %208 {strides = array<i32>} : memref<2x32xf32, #tpu.memory_space<vmem>>, vector<2x32xf32>,
    %c0_87 = arith.constant 0 : index
    %c0_88 = arith.constant 0 : index
    %210 = vector.load %arg12[%c0_87, %c0_88] : memref<2x32xf32, #tpu.memory_space<vmem>>, vector<2x32xf32>
    tpu.vector_store %arg12[%c0_87, %c0_88], %206 {strides = array<i32>} : memref<2x32xf32, #tpu.memory_space<vmem>>, vector<2x32xf32>,
    %211 = arith.truncf %208 : vector<2x32xf32> to vector<2x32xbf16>
    %212 = arith.index_cast %c4_i32 : i32 to index
    %c0_89 = arith.constant 0 : index
    %c0_90 = arith.constant 0 : index
    %213 = vector.load %arg7[%212, %c0_89, %c0_90] : memref<8x2x32xbf16, #tpu.memory_space<vmem>>, vector<1x2x32xbf16>
    %214 = vector.shape_cast %213 : vector<1x2x32xbf16> to vector<2x32xbf16>
    %215 = vector.shape_cast %211 : vector<2x32xbf16> to vector<1x2x32xbf16>
    tpu.vector_store %arg7[%212, %c0_89, %c0_90], %215 {strides = array<i32>} : memref<8x2x32xbf16, #tpu.memory_space<vmem>>, vector<1x2x32xbf16>,
    %c5_i32 = arith.constant 5 : i32
    %c2_i32_91 = arith.constant 2 : i32
    %216 = arith.muli %c5_i32, %c2_i32_91 : i32
    %217 = tpu.assume_multiple %216, 2 : i32
    %218 = arith.index_cast %217 : i32 to index
    %c0_92 = arith.constant 0 : index
    %219 = vector.load %arg10[%218, %c0_92] : memref<16x128xf32, #tpu.memory_space<vmem>>, vector<2x128xf32>
    %c0_93 = arith.constant 0 : index
    %c0_94 = arith.constant 0 : index
    %220 = vector.load %arg11[%c0_93, %c0_94] : memref<2x32xf32, #tpu.memory_space<vmem>>, vector<2x32xf32>
    %221 = arith.truncf %220 : vector<2x32xf32> to vector<2x32xbf16>
    %cst_95 = arith.constant dense<0.000000e+00> : vector<2x128xf32>
    %222 = tpu.matmul %221, %10, %cst_95 {dimension_numbers = #tpu.dot_dimension_numbers<[1], [0], [0], [1], [0, 0, 1, 1], [], []>} : vector<2x32xbf16>, vector<32x128xbf16>, vector<2x128xf32> -> vector<2x128xf32>
    %223 = arith.addf %219, %222 : vector<2x128xf32>
    %224 = vector.extract_strided_slice %223 {offsets = [0, 0], sizes = [2, 32], strides = [1, 1]} : vector<2x128xf32> to vector<2x32xf32>
    %225 = arith.negf %224 : vector<2x32xf32>
    %226 = math.exp %225 : vector<2x32xf32>
    %cst_96 = arith.constant 1.000000e+00 : f32
    %227 = vector.broadcast %cst_96 : f32 to vector<2x32xf32>
    %228 = arith.addf %227, %226 : vector<2x32xf32>
    %229 = arith.divf %227, %228 : vector<2x32xf32>
    %230 = vector.extract_strided_slice %223 {offsets = [0, 32], sizes = [2, 32], strides = [1, 1]} : vector<2x128xf32> to vector<2x32xf32>
    %231 = arith.negf %230 : vector<2x32xf32>
    %232 = math.exp %231 : vector<2x32xf32>
    %cst_97 = arith.constant 1.000000e+00 : f32
    %233 = vector.broadcast %cst_97 : f32 to vector<2x32xf32>
    %234 = arith.addf %233, %232 : vector<2x32xf32>
    %235 = arith.divf %233, %234 : vector<2x32xf32>
    %236 = vector.extract_strided_slice %223 {offsets = [0, 64], sizes = [2, 32], strides = [1, 1]} : vector<2x128xf32> to vector<2x32xf32>
    %237 = math.tanh %236 : vector<2x32xf32>
    %238 = vector.extract_strided_slice %223 {offsets = [0, 96], sizes = [2, 32], strides = [1, 1]} : vector<2x128xf32> to vector<2x32xf32>
    %239 = arith.negf %238 : vector<2x32xf32>
    %240 = math.exp %239 : vector<2x32xf32>
    %cst_98 = arith.constant 1.000000e+00 : f32
    %241 = vector.broadcast %cst_98 : f32 to vector<2x32xf32>
    %242 = arith.addf %241, %240 : vector<2x32xf32>
    %243 = arith.divf %241, %242 : vector<2x32xf32>
    %c0_99 = arith.constant 0 : index
    %c0_100 = arith.constant 0 : index
    %244 = vector.load %arg12[%c0_99, %c0_100] : memref<2x32xf32, #tpu.memory_space<vmem>>, vector<2x32xf32>
    %245 = arith.mulf %235, %244 : vector<2x32xf32>
    %246 = arith.mulf %229, %237 : vector<2x32xf32>
    %247 = arith.addf %245, %246 : vector<2x32xf32>
    %248 = math.tanh %247 : vector<2x32xf32>
    %249 = arith.mulf %243, %248 : vector<2x32xf32>
    %c0_101 = arith.constant 0 : index
    %c0_102 = arith.constant 0 : index
    %250 = vector.load %arg11[%c0_101, %c0_102] : memref<2x32xf32, #tpu.memory_space<vmem>>, vector<2x32xf32>
    tpu.vector_store %arg11[%c0_101, %c0_102], %249 {strides = array<i32>} : memref<2x32xf32, #tpu.memory_space<vmem>>, vector<2x32xf32>,
    %c0_103 = arith.constant 0 : index
    %c0_104 = arith.constant 0 : index
    %251 = vector.load %arg12[%c0_103, %c0_104] : memref<2x32xf32, #tpu.memory_space<vmem>>, vector<2x32xf32>
    tpu.vector_store %arg12[%c0_103, %c0_104], %247 {strides = array<i32>} : memref<2x32xf32, #tpu.memory_space<vmem>>, vector<2x32xf32>,
    %252 = arith.truncf %249 : vector<2x32xf32> to vector<2x32xbf16>
    %253 = arith.index_cast %c5_i32 : i32 to index
    %c0_105 = arith.constant 0 : index
    %c0_106 = arith.constant 0 : index
    %254 = vector.load %arg7[%253, %c0_105, %c0_106] : memref<8x2x32xbf16, #tpu.memory_space<vmem>>, vector<1x2x32xbf16>
    %255 = vector.shape_cast %254 : vector<1x2x32xbf16> to vector<2x32xbf16>
    %256 = vector.shape_cast %252 : vector<2x32xbf16> to vector<1x2x32xbf16>
    tpu.vector_store %arg7[%253, %c0_105, %c0_106], %256 {strides = array<i32>} : memref<8x2x32xbf16, #tpu.memory_space<vmem>>, vector<1x2x32xbf16>,
    %c6_i32 = arith.constant 6 : i32
    %c2_i32_107 = arith.constant 2 : i32
    %257 = arith.muli %c6_i32, %c2_i32_107 : i32
    %258 = tpu.assume_multiple %257, 2 : i32
    %259 = arith.index_cast %258 : i32 to index
    %c0_108 = arith.constant 0 : index
    %260 = vector.load %arg10[%259, %c0_108] : memref<16x128xf32, #tpu.memory_space<vmem>>, vector<2x128xf32>
    %c0_109 = arith.constant 0 : index
    %c0_110 = arith.constant 0 : index
    %261 = vector.load %arg11[%c0_109, %c0_110] : memref<2x32xf32, #tpu.memory_space<vmem>>, vector<2x32xf32>
    %262 = arith.truncf %261 : vector<2x32xf32> to vector<2x32xbf16>
    %cst_111 = arith.constant dense<0.000000e+00> : vector<2x128xf32>
    %263 = tpu.matmul %262, %10, %cst_111 {dimension_numbers = #tpu.dot_dimension_numbers<[1], [0], [0], [1], [0, 0, 1, 1], [], []>} : vector<2x32xbf16>, vector<32x128xbf16>, vector<2x128xf32> -> vector<2x128xf32>
    %264 = arith.addf %260, %263 : vector<2x128xf32>
    %265 = vector.extract_strided_slice %264 {offsets = [0, 0], sizes = [2, 32], strides = [1, 1]} : vector<2x128xf32> to vector<2x32xf32>
    %266 = arith.negf %265 : vector<2x32xf32>
    %267 = math.exp %266 : vector<2x32xf32>
    %cst_112 = arith.constant 1.000000e+00 : f32
    %268 = vector.broadcast %cst_112 : f32 to vector<2x32xf32>
    %269 = arith.addf %268, %267 : vector<2x32xf32>
    %270 = arith.divf %268, %269 : vector<2x32xf32>
    %271 = vector.extract_strided_slice %264 {offsets = [0, 32], sizes = [2, 32], strides = [1, 1]} : vector<2x128xf32> to vector<2x32xf32>
    %272 = arith.negf %271 : vector<2x32xf32>
    %273 = math.exp %272 : vector<2x32xf32>
    %cst_113 = arith.constant 1.000000e+00 : f32
    %274 = vector.broadcast %cst_113 : f32 to vector<2x32xf32>
    %275 = arith.addf %274, %273 : vector<2x32xf32>
    %276 = arith.divf %274, %275 : vector<2x32xf32>
    %277 = vector.extract_strided_slice %264 {offsets = [0, 64], sizes = [2, 32], strides = [1, 1]} : vector<2x128xf32> to vector<2x32xf32>
    %278 = math.tanh %277 : vector<2x32xf32>
    %279 = vector.extract_strided_slice %264 {offsets = [0, 96], sizes = [2, 32], strides = [1, 1]} : vector<2x128xf32> to vector<2x32xf32>
    %280 = arith.negf %279 : vector<2x32xf32>
    %281 = math.exp %280 : vector<2x32xf32>
    %cst_114 = arith.constant 1.000000e+00 : f32
    %282 = vector.broadcast %cst_114 : f32 to vector<2x32xf32>
    %283 = arith.addf %282, %281 : vector<2x32xf32>
    %284 = arith.divf %282, %283 : vector<2x32xf32>
    %c0_115 = arith.constant 0 : index
    %c0_116 = arith.constant 0 : index
    %285 = vector.load %arg12[%c0_115, %c0_116] : memref<2x32xf32, #tpu.memory_space<vmem>>, vector<2x32xf32>
    %286 = arith.mulf %276, %285 : vector<2x32xf32>
    %287 = arith.mulf %270, %278 : vector<2x32xf32>
    %288 = arith.addf %286, %287 : vector<2x32xf32>
    %289 = math.tanh %288 : vector<2x32xf32>
    %290 = arith.mulf %284, %289 : vector<2x32xf32>
    %c0_117 = arith.constant 0 : index
    %c0_118 = arith.constant 0 : index
    %291 = vector.load %arg11[%c0_117, %c0_118] : memref<2x32xf32, #tpu.memory_space<vmem>>, vector<2x32xf32>
    tpu.vector_store %arg11[%c0_117, %c0_118], %290 {strides = array<i32>} : memref<2x32xf32, #tpu.memory_space<vmem>>, vector<2x32xf32>,
    %c0_119 = arith.constant 0 : index
    %c0_120 = arith.constant 0 : index
    %292 = vector.load %arg12[%c0_119, %c0_120] : memref<2x32xf32, #tpu.memory_space<vmem>>, vector<2x32xf32>
    tpu.vector_store %arg12[%c0_119, %c0_120], %288 {strides = array<i32>} : memref<2x32xf32, #tpu.memory_space<vmem>>, vector<2x32xf32>,
    %293 = arith.truncf %290 : vector<2x32xf32> to vector<2x32xbf16>
    %294 = arith.index_cast %c6_i32 : i32 to index
    %c0_121 = arith.constant 0 : index
    %c0_122 = arith.constant 0 : index
    %295 = vector.load %arg7[%294, %c0_121, %c0_122] : memref<8x2x32xbf16, #tpu.memory_space<vmem>>, vector<1x2x32xbf16>
    %296 = vector.shape_cast %295 : vector<1x2x32xbf16> to vector<2x32xbf16>
    %297 = vector.shape_cast %293 : vector<2x32xbf16> to vector<1x2x32xbf16>
    tpu.vector_store %arg7[%294, %c0_121, %c0_122], %297 {strides = array<i32>} : memref<8x2x32xbf16, #tpu.memory_space<vmem>>, vector<1x2x32xbf16>,
    %c7_i32 = arith.constant 7 : i32
    %c2_i32_123 = arith.constant 2 : i32
    %298 = arith.muli %c7_i32, %c2_i32_123 : i32
    %299 = tpu.assume_multiple %298, 2 : i32
    %300 = arith.index_cast %299 : i32 to index
    %c0_124 = arith.constant 0 : index
    %301 = vector.load %arg10[%300, %c0_124] : memref<16x128xf32, #tpu.memory_space<vmem>>, vector<2x128xf32>
    %c0_125 = arith.constant 0 : index
    %c0_126 = arith.constant 0 : index
    %302 = vector.load %arg11[%c0_125, %c0_126] : memref<2x32xf32, #tpu.memory_space<vmem>>, vector<2x32xf32>
    %303 = arith.truncf %302 : vector<2x32xf32> to vector<2x32xbf16>
    %cst_127 = arith.constant dense<0.000000e+00> : vector<2x128xf32>
    %304 = tpu.matmul %303, %10, %cst_127 {dimension_numbers = #tpu.dot_dimension_numbers<[1], [0], [0], [1], [0, 0, 1, 1], [], []>} : vector<2x32xbf16>, vector<32x128xbf16>, vector<2x128xf32> -> vector<2x128xf32>
    %305 = arith.addf %301, %304 : vector<2x128xf32>
    %306 = vector.extract_strided_slice %305 {offsets = [0, 0], sizes = [2, 32], strides = [1, 1]} : vector<2x128xf32> to vector<2x32xf32>
    %307 = arith.negf %306 : vector<2x32xf32>
    %308 = math.exp %307 : vector<2x32xf32>
    %cst_128 = arith.constant 1.000000e+00 : f32
    %309 = vector.broadcast %cst_128 : f32 to vector<2x32xf32>
    %310 = arith.addf %309, %308 : vector<2x32xf32>
    %311 = arith.divf %309, %310 : vector<2x32xf32>
    %312 = vector.extract_strided_slice %305 {offsets = [0, 32], sizes = [2, 32], strides = [1, 1]} : vector<2x128xf32> to vector<2x32xf32>
    %313 = arith.negf %312 : vector<2x32xf32>
    %314 = math.exp %313 : vector<2x32xf32>
    %cst_129 = arith.constant 1.000000e+00 : f32
    %315 = vector.broadcast %cst_129 : f32 to vector<2x32xf32>
    %316 = arith.addf %315, %314 : vector<2x32xf32>
    %317 = arith.divf %315, %316 : vector<2x32xf32>
    %318 = vector.extract_strided_slice %305 {offsets = [0, 64], sizes = [2, 32], strides = [1, 1]} : vector<2x128xf32> to vector<2x32xf32>
    %319 = math.tanh %318 : vector<2x32xf32>
    %320 = vector.extract_strided_slice %305 {offsets = [0, 96], sizes = [2, 32], strides = [1, 1]} : vector<2x128xf32> to vector<2x32xf32>
    %321 = arith.negf %320 : vector<2x32xf32>
    %322 = math.exp %321 : vector<2x32xf32>
    %cst_130 = arith.constant 1.000000e+00 : f32
    %323 = vector.broadcast %cst_130 : f32 to vector<2x32xf32>
    %324 = arith.addf %323, %322 : vector<2x32xf32>
    %325 = arith.divf %323, %324 : vector<2x32xf32>
    %c0_131 = arith.constant 0 : index
    %c0_132 = arith.constant 0 : index
    %326 = vector.load %arg12[%c0_131, %c0_132] : memref<2x32xf32, #tpu.memory_space<vmem>>, vector<2x32xf32>
    %327 = arith.mulf %317, %326 : vector<2x32xf32>
    %328 = arith.mulf %311, %319 : vector<2x32xf32>
    %329 = arith.addf %327, %328 : vector<2x32xf32>
    %330 = math.tanh %329 : vector<2x32xf32>
    %331 = arith.mulf %325, %330 : vector<2x32xf32>
    %c0_133 = arith.constant 0 : index
    %c0_134 = arith.constant 0 : index
    %332 = vector.load %arg11[%c0_133, %c0_134] : memref<2x32xf32, #tpu.memory_space<vmem>>, vector<2x32xf32>
    tpu.vector_store %arg11[%c0_133, %c0_134], %331 {strides = array<i32>} : memref<2x32xf32, #tpu.memory_space<vmem>>, vector<2x32xf32>,
    %c0_135 = arith.constant 0 : index
    %c0_136 = arith.constant 0 : index
    %333 = vector.load %arg12[%c0_135, %c0_136] : memref<2x32xf32, #tpu.memory_space<vmem>>, vector<2x32xf32>
    tpu.vector_store %arg12[%c0_135, %c0_136], %329 {strides = array<i32>} : memref<2x32xf32, #tpu.memory_space<vmem>>, vector<2x32xf32>,
    %334 = arith.truncf %331 : vector<2x32xf32> to vector<2x32xbf16>
    %335 = arith.index_cast %c7_i32 : i32 to index
    %c0_137 = arith.constant 0 : index
    %c0_138 = arith.constant 0 : index
    %336 = vector.load %arg7[%335, %c0_137, %c0_138] : memref<8x2x32xbf16, #tpu.memory_space<vmem>>, vector<1x2x32xbf16>
    %337 = vector.shape_cast %336 : vector<1x2x32xbf16> to vector<2x32xbf16>
    %338 = vector.shape_cast %334 : vector<2x32xbf16> to vector<1x2x32xbf16>
    tpu.vector_store %arg7[%335, %c0_137, %c0_138], %338 {strides = array<i32>} : memref<8x2x32xbf16, #tpu.memory_space<vmem>>, vector<1x2x32xbf16>,
    %c8_i32 = arith.constant 8 : i32
    %c0_i32_139 = arith.constant 0 : i32
    %339 = arith.cmpi eq, %arg0, %c0_i32_139 : i32
    %340 = arith.extui %339 : i1 to i32
    %c0_i32_140 = arith.constant 0 : i32
    %341 = arith.cmpi ne, %340, %c0_i32_140 : i32
    scf.if %341 {
      %c0_141 = arith.constant 0 : index
      %c0_142 = arith.constant 0 : index
      %342 = vector.load %arg11[%c0_141, %c0_142] : memref<2x32xf32, #tpu.memory_space<vmem>>, vector<2x32xf32>
      %c0_143 = arith.constant 0 : index
      %c0_144 = arith.constant 0 : index
      %343 = vector.load %arg8[%c0_143, %c0_144] : memref<2x32xf32, #tpu.memory_space<vmem>>, vector<2x32xf32>
      tpu.vector_store %arg8[%c0_143, %c0_144], %342 {strides = array<i32>} : memref<2x32xf32, #tpu.memory_space<vmem>>, vector<2x32xf32>,
      %c0_145 = arith.constant 0 : index
      %c0_146 = arith.constant 0 : index
      %344 = vector.load %arg12[%c0_145, %c0_146] : memref<2x32xf32, #tpu.memory_space<vmem>>, vector<2x32xf32>
      %c0_147 = arith.constant 0 : index
      %c0_148 = arith.constant 0 : index
      %345 = vector.load %arg9[%c0_147, %c0_148] : memref<2x32xf32, #tpu.memory_space<vmem>>, vector<2x32xf32>
      tpu.vector_store %arg9[%c0_147, %c0_148], %344 {strides = array<i32>} : memref<2x32xf32, #tpu.memory_space<vmem>>, vector<2x32xf32>,
    } else {
    }
    return
  }
  func.func @transform_0(%arg0: i32) -> (i32, i32) {
    %c0_i32 = arith.constant 0 : i32
    %c0_i32_0 = arith.constant 0 : i32
    return %arg0, %c0_i32 : i32, i32
  }
  func.func @transform_1(%arg0: i32) -> (i32, i32) {
    %c0_i32 = arith.constant 0 : i32
    %c0_i32_0 = arith.constant 0 : i32
    %c0_i32_1 = arith.constant 0 : i32
    return %c0_i32, %c0_i32_0 : i32, i32
  }
  func.func @transform_2(%arg0: i32) -> (i32, i32) {
    %c0_i32 = arith.constant 0 : i32
    %c0_i32_0 = arith.constant 0 : i32
    %c0_i32_1 = arith.constant 0 : i32
    return %c0_i32, %c0_i32_0 : i32, i32
  }
  func.func @transform_3(%arg0: i32) -> (i32, i32) {
    %c0_i32 = arith.constant 0 : i32
    %c0_i32_0 = arith.constant 0 : i32
    %c0_i32_1 = arith.constant 0 : i32
    return %c0_i32, %c0_i32_0 : i32, i32
  }
  func.func @transform_4(%arg0: i32) -> (i32, i32) {
    %c0_i32 = arith.constant 0 : i32
    %c0_i32_0 = arith.constant 0 : i32
    %c0_i32_1 = arith.constant 0 : i32
    return %c0_i32, %c0_i32_0 : i32, i32
  }
  func.func @transform_5(%arg0: i32) -> (i32, i32) {
    %c0_i32 = arith.constant 0 : i32
    %c0_i32_0 = arith.constant 0 : i32
    %c0_i32_1 = arith.constant 0 : i32
    return %c0_i32, %c0_i32_0 : i32, i32
  }
  func.func @transform_6(%arg0: i32) -> (i32, i32, i32) {
    %c0_i32 = arith.constant 0 : i32
    %c0_i32_0 = arith.constant 0 : i32
    %c0_i32_1 = arith.constant 0 : i32
    return %arg0, %c0_i32, %c0_i32_0 : i32, i32, i32
  }
  func.func @transform_7(%arg0: i32) -> (i32, i32) {
    %c0_i32 = arith.constant 0 : i32
    %c0_i32_0 = arith.constant 0 : i32
    %c0_i32_1 = arith.constant 0 : i32
    return %c0_i32, %c0_i32_0 : i32, i32
  }
  func.func @transform_8(%arg0: i32) -> (i32, i32) {
    %c0_i32 = arith.constant 0 : i32
    %c0_i32_0 = arith.constant 0 : i32
    %c0_i32_1 = arith.constant 0 : i32
    return %c0_i32, %c0_i32_0 : i32, i32
  }
}

</mosaic_0001>

<bundles_post_ra>
// kernel: tpu_custom_call.1
= control target key start
LH: loop header
LB: loop body
LE: loop exit
PB: predicated region body
PF: predicated region fallthrough
CT: control target
= control target key end

     0   :  { %7 = vsyncpa [#allocation3], 0  ;;  %s633_s0 = inlined_call_operand.hbm [shape: f32[16,128], index: 0, kind: input, shape index: {}]   ;;  %s634_s1 = inlined_call_operand.hbm [shape: f32[8,128], index: 1, kind: input, shape index: {}]   ;;  %s635_s2 = inlined_call_operand.hbm [shape: f32[16,128], index: 2, kind: output, shape index: {}]  }
   0x1   :  { %9 = vsyncpa [#allocation3 + $0x1], 0 }
   0x2   :  { %10 = vsyncpa [#allocation6], 0 }
   0x3   :  { %11 = vsyncpa [#allocation4], 0 }
   0x4   :  { %13 = vsyncpa [#allocation4 + $0x1], 0  ;;  %s495_s9 = smov 0   ;;  %s497_s10 = smov 0  }
   0x5   :  { %s499_s11 = smov 0   ;;  %s501_s12 = smov 0  }
   0x6 LB: > { %s516_s13 = sadd.s32 4294967295, %s477_s12   ;;  %s276_s14 = sadd.s32 4294967294, %s477_s12   ;;  %s477_s12 = sphi %s501_s12, %s645_s12   ;;  %s473_s11 = sphi %s499_s11, %s644_s11   ;;  %s469_s10 = sphi %s497_s10, %s643_s10   ;;  %s465_s9 = sphi %s495_s9, %s642_s9  }
   0x7   : > { %p39_p0 = scmp.ne.s32.totalorder %s469_s10, %s465_s9  ;;  %p40_p1 = scmp.eq.s32.totalorder %s516_s13, 0 }
   0x8   : > { %p84_p2 = scmp.eq.s32.totalorder %s516_s13, 1  ;;  %p90_p3 = scmp.eq.s32.totalorder %s276_s14, 1 }
   0x9   : > { %p525_p4 = por %p40_p1, %p39_p0  ;;  %p277_p5 = scmp.ge.s32.totalorder %s477_s12, 1 }
   0xa   : > { %p530_p6 = por %p90_p3, %p39_p0  ;;  %p97_p7 = scmp.lt.s32.totalorder %s477_s12, 3 }
   0xb   : > { %s109_s19 = sshll.u32 %s634_s1, 4  ;;  %s479_s21 = smov [#allocation5]   ;;  %s110_s19 = int_to_ptr.hbm [resolvable:$true] %s109_s19 }
   0xc   : > { %p538_p8 = pnand %p277_p5, %p97_p7  ;;  %s111_s22 = sshll.u32 %s479_s21, 4  ;;  %s112_s22 = int_to_ptr.vmem [resolvable:$true] %s111_s22 }
   0xd   : > { %s548_s23 = sadd.s32 1, %s477_s12   ;;  %s26_s24 = sadd.s32 1, %s473_s11 }
   0xe   : > { %p298_p10 = pneg %p538_p8  ;;  %s23_s25 = ssub.s32 %s477_s12, %s548_s23 }
   0xf   : > { %p24_p12 = scmp.eq.s32.totalorder %s23_s25, 0  ;;  %p33_p13 = scmp.ne.s32.totalorder %s473_s11, %s469_s10 }
  0x10   : > { %p299_p11 = pnand %p298_p10, %p40_p1  ;;  %p34_p0 = scmp.eq.s32.totalorder %s477_s12, 0 }
  0x11   : > { %s557_s26 = scalar_select %p24_p12, %s473_s11, %s26_s24  }
  0x12   : > { %301 = dma.hbm_to_vmem [thread:$0]  (!%p299_p11), %s110_s19, 128, %s112_s22, [#allocation6]  }
  0x13   : > { %p561_p3 = por %p84_p2, %p33_p13  ;;  %p311_p5 = scmp.lt.s32.totalorder %s477_s12, 2 }
  0x14   : > { %s122_s28 = sand.u32 1, %s473_s11   ;;  %s281_s29 = sshll.u32 %s477_s12, 3 }
  0x15   : > { %p35_p7 = por %p34_p0, %p33_p13  ;;  %s280_s30 = sshll.u32 %s122_s28, 3 }
  0x16   : > { %s130_s5 = scalar_lea.hbm %s633_s0, %s281_s29  ;;  %s126_s7 = scalar_lea.vmem [#allocation2], %s280_s30 }
  0x17   : > { %s132_s6 = sshll.u32 %s130_s5, 4  ;;  %s134_s8 = sshll.u32 %s126_s7, 4  ;;  %s133_s6 = int_to_ptr.hbm [resolvable:$true] %s132_s6  ;;  %s135_s8 = int_to_ptr.vmem [resolvable:$true] %s134_s8 }
  0x18   : > { %p571_p10 = pnand %p311_p5, %p35_p7  ;;  %s123_s17 = scalar_lea.sflag [#allocation3], %s122_s28 }
  0x19   : > { %s377_s18 = sshra.s32 %s133_s6, 4  ;;  %s384_s24 = scalar_lea.hbm %s633_s0, 16  ;;  %s378_s18 = int_to_ptr.hbm [resolvable:$true] %s377_s18 }
  0x1a   : > { %s379_s19 = scalar_lea.hbm %s378_s18, 8  ;;  %p381_p11 = pneg %p571_p10 }
  0x1b   : > { %p380_p2 = scmp.ne.s32.totalorder %s378_s18, %s379_s19  ;;  %p385_p0 = scmp.lt.s32.totalorder %s378_s18, %s633_s0 }
  0x1c   : > { %p386_p5 = scmp.lt.s32.totalorder %s384_s24, %s379_s19 }
  0x1d   : > { %p382_p12 = pnand %p381_p11, %p380_p2 }
  0x1e   : > { %p387_p7 = por %p386_p5, %p385_p0 }
  0x1f   : > { %p383_p13 = pneg %p382_p12 }
  0x21   : > { %p388_p9 = pnand %p387_p7, %p383_p13 }
  0x23   : > { %391 = shalt.err (!%p388_p9)
}
  0x24   : > { %305 = dma.hbm_to_vmem [thread:$0]  (!%p571_p10), %s133_s6, 128, %s135_s8, %s123_s17  }
  0x25   : > { %143 = sbr.rel (%p538_p8) target bundleno = 60 (0x3c), region = 28  ;;  %s588_s28 = sand.u32 (!%p538_p8), 1, %s469_s10  }
  0x26   : > { %s283_s30 = sshll.u32 (!%p538_p8), %s588_s28, 3  ;;  %s146_s3 = scalar_lea.sflag (!%p538_p8), [#allocation3], %s588_s28 }
  0x27   : > { %s149_s4 = scalar_lea.vmem (!%p538_p8), [#allocation2], %s283_s30 }
  0x2a   : > { %452 = dma.done.wait (%p525_p4), %s146_s3, 128  }
  0x2b   : > { %454 = vsyncadd (%p525_p4), %s146_s3, 4294967168 }
  0x2c   : > { %456 = dma.done.wait (%p40_p1), [#allocation6], 128  }
  0x2d   : > { %458 = vsyncadd (%p40_p1), [#allocation6], 4294967168  ;;  %s287_s20 = sshll.u32 %s516_s13, 3  ;;  %s175_s8 = scalar_lea.vmem [#allocation7], %s283_s30  ;;  %v176_v0 = vld [vmem:[%s149_s4] sm:$0xff]  ;;  %v177_v1 = vld [vmem:[#allocation5] sm:$0xff] }
  0x2e   : > { %s191_s7 = scalar_lea.hbm %s635_s2, %s287_s20  ;;  %s193_s14 = sshll.u32 %s175_s8, 4  ;;  %v178_v2 = vadd.f32 %v177_v1, %v176_v0  ;;  %s194_s14 = int_to_ptr.vmem [resolvable:$true] %s193_s14 }
  0x2f   : > { %s195_s17 = sshll.u32 %s191_s7, 4  ;;  %s181_s15 = scalar_lea.sflag [#allocation4], %s588_s28  ;;  %s196_s17 = int_to_ptr.hbm [resolvable:$true] %s195_s17 }
  0x30   : > { %179 = vst [vmem:[%s175_s8] sm:$0xff] %v178_v2  ;;  %s421_s18 = sshra.s32 %s196_s17, 4  ;;  %s427_s22 = scalar_lea.hbm %s635_s2, 16  ;;  %s422_s18 = int_to_ptr.hbm [resolvable:$true] %s421_s18 }
  0x31   : > { %s423_s19 = scalar_lea.hbm %s422_s18, 8  ;;  %p428_p9 = scmp.lt.s32.totalorder %s422_s18, %s635_s2 }
  0x32   : > { %p424_p1 = scmp.ne.s32.totalorder %s422_s18, %s423_s19  ;;  %p429_p10 = scmp.lt.s32.totalorder %s427_s22, %s423_s19 }
  0x34   : > { %p425_p4 = pnand %p424_p1, %p561_p3  ;;  %p430_p2 = por %p429_p10, %p428_p9 }
  0x36   : > { %p426_p8 = pneg %p425_p4 }
  0x38   : > { %p431_p11 = pnand %p430_p2, %p426_p8 }
  0x3a   : > { %434 = shalt.err (!%p431_p11)
}
  0x3b   : > { %296 = dma.vmem_to_hbm [thread:$0]  (%p561_p3), %s194_s14, 128, %s196_s17, %s181_s15  }
  0x3c PF: > { %s207_s29 = sand.u32 1, %s465_s9   ;;  %p641_p12 = scmp.ge.s32.totalorder %s477_s12, 2 }
  0x3d   : > { %s208_s28 = scalar_lea.sflag [#allocation4], %s207_s29 }
  0x3e   : > { %p307_p13 = pnand %p641_p12, %p530_p6 }
  0x40   : > { %p308_p0 = pneg %p307_p13 }
  0x42   : > { %460 = dma.done.wait (%p308_p0), %s208_s28, 128  }
  0x43   : > { %462 = vsyncadd (%p308_p0), %s208_s28, 4294967168  ;;  %p16_p5 = scmp.ge.s32.totalorder %s548_s23, 4   ;;  %s642_s9 = smov %s469_s10 }
  0x44   : > { %s643_s10 = smov %s473_s11  ;;  %s644_s11 = smov %s557_s26 }
  0x45   : > { %s645_s12 = smov %s548_s23  ;;  %18 = sbr.rel (!%p16_p5) target bundleno = 6 (0x6), region = 77 }
  0x4a   :  { %214 = vsyncpa [#allocation3], 1 }
  0x4b   :  { %216 = vsyncpa [#allocation3 + $0x1], 1 }
  0x4c   :  { %217 = vsyncpa [#allocation6], 1 }
  0x4d   :  { %218 = vsyncpa [#allocation4], 1 }
  0x4e   :  { %220 = vsyncpa [#allocation4 + $0x1], 1 }

// kernel: tpu_custom_call.1
= control target key start
LH: loop header
LB: loop body
LE: loop exit
PB: predicated region body
PF: predicated region fallthrough
CT: control target
= control target key end

     0   :  { %14 = vsyncpa [#allocation6], 0  ;;  %s1466_s0 = inlined_call_operand.hbm [shape: bf16[16,32], index: 0, kind: input, shape index: {}]   ;;  %s1467_s1 = inlined_call_operand.hbm [shape: f32[2,32], index: 1, kind: input, shape index: {}]   ;;  %s1468_s2 = inlined_call_operand.hbm [shape: f32[2,32], index: 2, kind: input, shape index: {}]   ;;  %s1469_s3 = inlined_call_operand.hbm [shape: bf16[32,128], index: 3, kind: input, shape index: {}]   ;;  %s1470_s4 = inlined_call_operand.hbm [shape: bf16[32,128], index: 4, kind: input, shape index: {}]   ;;  %s1471_s5 = inlined_call_operand.vmem [shape: f32[1,128], index: 5, kind: input, shape index: {}]   ;;  %s1472_s6 = inlined_call_operand.hbm [shape: bf16[8,2,32], index: 6, kind: output, shape index: {0}]   ;;  %s1473_s7 = inlined_call_operand.hbm [shape: f32[2,32], index: 7, kind: output, shape index: {1}]   ;;  %s1474_s8 = inlined_call_operand.hbm [shape: f32[2,32], index: 8, kind: output, shape index: {2}]  }
   0x1   :  { %15 = vsyncpa [#allocation9], 0 }
   0x2   :  { %16 = vsyncpa [#allocation12], 0 }
   0x3   :  { %17 = vsyncpa [#allocation7], 0  ;;  %s37_s29 = sshll.u32 %s1467_s1, 4  ;;  %s38_s29 = int_to_ptr.hbm [resolvable:$true] %s37_s29 }
   0x4   :  { %18 = vsyncpa [#allocation16], 0  ;;  %s1238_s30 = smov [#allocation8]   ;;  %s58_s12 = sshll.u32 %s1469_s3, 4  ;;  %s59_s12 = int_to_ptr.hbm [resolvable:$true] %s58_s12 }
   0x5   :  { %s39_s9 = sshll.u32 %s1238_s30, 4  ;;  %s1239_s13 = smov [#allocation11]   ;;  %s40_s9 = int_to_ptr.vmem [resolvable:$true] %s39_s9 }
   0x6   :  { %42 = dma.hbm_to_vmem [thread:$0]  %s38_s29, 32, %s40_s9, [#allocation9]  }
   0x7   :  { %s60_s14 = sshll.u32 %s1239_s13, 4  ;;  %s23_s17 = sshll.u32 %s1466_s0, 4  ;;  %s61_s14 = int_to_ptr.vmem [resolvable:$true] %s60_s14  ;;  %s24_s17 = int_to_ptr.hbm [resolvable:$true] %s23_s17 }
   0x8   :  { %s1240_s1 = smov 64   ;;  %s1241_s18 = smov 4  }
   0x9   :  { %66 = dma.hbm_to_vmem [thread:$0]  %s59_s12, 256, %s61_s14, [#allocation12], %s1240_s1, %s1240_s1, %s1241_s18  }
   0xa   :  { %s48_s21 = sshll.u32 %s1468_s2, 4  ;;  %s1242_s22 = smov [#allocation5]   ;;  %s49_s21 = int_to_ptr.hbm [resolvable:$true] %s48_s21 }
   0xb   :  { %s25_s3 = sshll.u32 %s1242_s22, 4  ;;  %s1243_s23 = smov [#allocation10]   ;;  %s26_s3 = int_to_ptr.vmem [resolvable:$true] %s25_s3 }
   0xc   :  { %31 = dma.hbm_to_vmem [thread:$0]  %s24_s17, 128, %s26_s3, [#allocation6], %s1240_s1, %s1240_s1, %s1241_s18  }
   0xd   :  { %s50_s0 = sshll.u32 %s1243_s23, 4  ;;  %s71_s26 = sshll.u32 %s1470_s4, 4  ;;  %s51_s0 = int_to_ptr.vmem [resolvable:$true] %s50_s0  ;;  %s72_s26 = int_to_ptr.hbm [resolvable:$true] %s71_s26 }
   0xe   :  { %53 = dma.hbm_to_vmem [thread:$0]  %s49_s21, 32, %s51_s0, [#allocation9]  }
   0xf   :  { %s1244_s27 = smov [#allocation13]  }
  0x10   :  { %s73_s28 = sshll.u32 %s1244_s27, 4  ;;  %s74_s28 = int_to_ptr.vmem [resolvable:$true] %s73_s28 }
  0x11   :  { %79 = dma.hbm_to_vmem [thread:$0]  %s72_s26, 256, %s74_s28, [#allocation12], %s1240_s1, %s1240_s1, %s1241_s18  }
  0x12   :  { %1228 = dma.done.wait [#allocation6], 128  }
  0x13   :  { %1229 = vsyncadd [#allocation6], 4294967168 }
  0x14   :  { %1230 = dma.done.wait [#allocation9], 64  }
  0x15   :  { %1231 = vsyncadd [#allocation9], 4294967232 }
  0x16   :  { %1232 = dma.done.wait [#allocation12], 512  }
  0x17   :  { %1233 = vsyncadd [#allocation12], 4294966784  ;;  %vm108_vm0 = vcmask 254976   ;;  %v954_v0 = vld [vmem:[#allocation11 + $0x8] sm:$0xff]  ;;  %v956_v1 = vld [vmem:[#allocation13 + $0x8] sm:$0xff]  ;;  %vm139_vm1 = vcmask 261120  }
  0x18   :  { %v107_v2 = vld [vmem:[#allocation8] sm:$0x3]  ;;  %149 = vmatpush.bf16.msra.mxu0 %v954_v0  ;;  %187 = vmatpush.bf16.msra.mxu1 %v956_v1  ;;  %v953_v3 = vld [vmem:[#allocation11] sm:$0xff]  ;;  %v955_v4 = vld [vmem:[#allocation13] sm:$0xff]  ;;  %s1245_s29 = smov 32   ;;  %s1247_s30 = smov [#allocation15]  }
  0x19   :  { %109 = vst.msk [vmem:[#allocation3] sm:$0x3] %vm108_vm0, %v107_v2  ;;  %274 = vmatpush.bf16.msra.mxu2 %v956_v1  ;;  %359 = vmatpush.bf16.msra.mxu3 %v956_v1  ;;  %v952_v5 = vld [vmem:[#allocation5] sm:$0xff]  ;;  %v110_v8 = vld [vmem:[#allocation10] sm:$0x3]  ;;  %s881_s9 = sshll.u32 %s1247_s30, 4  ;;  %s882_s9 = int_to_ptr.vmem [resolvable:$true] %s881_s9 }
  0x1a   :  { %111 = vst.msk [vmem:[#allocation4] sm:$0x3] %vm108_vm0, %v110_v8  ;;  %v971_v9 = vld [vmem:[%s1471_s5] ss:$0 sm:$0xff]  ;;  %s1246_s5 = smov 96   ;;  %s883_s12 = sshll.u32 %s1473_s7, 4  ;;  %s884_s12 = int_to_ptr.hbm [resolvable:$true] %s883_s12 }
  0x1b   :  { %s1248_s13 = smov [#allocation17]   ;;  %s894_s17 = sshll.u32 %s1474_s8, 4  ;;  %s895_s17 = int_to_ptr.hbm [resolvable:$true] %s894_s17 }
  0x1c   :  { %150 = vmatpush.bf16.msra.mxu0 %v953_v3  ;;  %188 = vmatpush.bf16.msra.mxu1 %v955_v4  ;;  %s892_s14 = sshll.u32 %s1248_s13, 4  ;;  %s869_s20 = sshll.u32 %s1472_s6, 4  ;;  %s893_s14 = int_to_ptr.vmem [resolvable:$true] %s892_s14  ;;  %s870_s20 = int_to_ptr.hbm [resolvable:$true] %s869_s20 }
  0x1d   :  { %275 = vmatpush.bf16.msra.mxu2 %v955_v4  ;;  %360 = vmatpush.bf16.msra.mxu3 %v955_v4  ;;  %s1250_s8 = smov 16   ;;  %s1251_s21 = smov 1  }
  0x1f   :  { %927 = vmatmul.msk.bf16.vlgmr.msra.gmra.mxu0 %vm139_vm1, %v952_v5 }
  0x20   :  { %444 = vmatpush.bf16.msrb.mxu0 %v956_v1  ;;  %529 = vmatpush.bf16.msrb.mxu1 %v956_v1  ;;  %v164_v6 = vld [vmem:[#allocation3] sm:$0x3] }
  0x21   :  { %614 = vmatpush.bf16.msrb.mxu2 %v956_v1  ;;  %v165_v7 = vpack.c.bf16 %v164_v6, %v164_v6  ;;  %699 = vmatpush.bf16.msrb.mxu3 %v956_v1  ;;  %v215_v19 = vld [vmem:[#allocation4] sm:$0x3] }
  0x23   :  { %936 = vmatmul.msk.bf16.vlgmr.msra.gmra.mxu1 %vm139_vm1, %v165_v7 }
  0x24   :  { %445 = vmatpush.bf16.msrb.mxu0 %v955_v4  ;;  %530 = vmatpush.bf16.msrb.mxu1 %v955_v4 }
  0x25   :  { %615 = vmatpush.bf16.msrb.mxu2 %v955_v4  ;;  %700 = vmatpush.bf16.msrb.mxu3 %v955_v4 }
  0x28   :  { %784 = vmatpush.bf16.msra.mxu0 %v956_v1 }
  0x2c   :  { %785 = vmatpush.bf16.msra.mxu0 %v955_v4 }
  0x9c   :  { %v152_v10 = vpop.f32.mrf.mxu0 }
  0x9d   :  { %v153_v11 = vadd.f32 %v971_v9, %v152_v10 }
  0x9f   :  { %157 = vst [vmem:[#allocation2] sm:$0xff] %v153_v11 }
  0xa0   :  { %v190_v12 = vpop.f32.mrf.mxu1 }
  0xa4   :  { %v154_v13 = vpop.f32.mrf.mxu0 }
  0xa5   :  { %v155_v14 = vadd.f32 %v971_v9, %v154_v13 }
  0xa6   :  { %v163_v15 = vld [vmem:[#allocation2] sm:$0x3]  ;;  %v262_v47 = vld [vmem:[#allocation2 + $0x2] sm:$0x3] }
  0xa7   :  { %v194_v16 = vadd.f32 %v190_v12, %v163_v15  ;;  %158 = vst [vmem:[#allocation2 + $0x8] sm:$0xff] %v155_v14  ;;  %v347_v15 = vld [vmem:[#allocation2 + $0x4] sm:$0x3] }
  0xa8   :  { %v192_v17 = vpop.f32.mrf.mxu1 }
  0xa9   :  { %972 = vtanh.f32 %v194_v16  ;;  %v937_v20 = vmul.f32 -1.442695, %v194_v16 }
  0xab   :  { %974 = vpow2.f32 %v937_v20 }
  0xaf   :  { %v973_v18 = vpop.eup %972 }
  0xb0   :  { %222 = vrot.lane.b32.xlu0 %v973_v18, %s1240_s1 }
  0xb1   :  { %v975_v21 = vpop.eup %974 }
  0xb2   :  { %v198_v22 = vadd.f32 1.0, %v975_v21 }
  0xb4   :  { %976 = vrcp.f32 %v198_v22  ;;  %v210_v28 = vand.u32 2147483648, %v198_v22  ;;  %vm204_vm3 = vweird.f32 %v198_v22  ;;  %v208_v29 = vand.u32 2147483647, %v198_v22 }
  0xb6   :  { %v211_v31 = vor.u32 1.1754944e-38, %v210_v28  ;;  %vm209_vm5 = vcmp.eq.f32.partialorder %v208_v29, 8.507059e+37 }
  0xb8   :  { %217 = vrot.lane.b32.xlu0 %v215_v19, %s1245_s29 }
  0xba   :  { %v977_v23 = vpop.eup %976 }
  0xbb   :  { %v200_v24 = vmul.f32 %v977_v23, %v198_v22  ;;  %vm205_vm2 = vweird.f32 %v977_v23 }
  0xbc   :  { %vm206_vm4 = vmor %vm204_vm3, %vm205_vm2 }
  0xbd   :  { %v201_v25 = vsub.f32 1.0, %v200_v24 }
  0xbf   :  { %v202_v26 = vmul.f32 %v977_v23, %v201_v25 }
  0xc1   :  { %v203_v27 = vadd.f32 %v977_v23, %v202_v26 }
  0xc3   :  { %v207_v30 = vsel %vm206_vm4, %v977_v23, %v203_v27 }
  0xc4   :  { %v212_v33 = vsel %vm209_vm5, %v211_v31, %v207_v30 }
 0x122   :  { %v223_v32 = vpop.permute.xlu0 %222 }
 0x123   :  { %v225_v34 = vmul.f32 %v223_v32, %v212_v33 }
 0x125   :  { %227 = vrot.lane.b32.xlu1 %v225_v34, %s1245_s29 }
 0x12a   :  { %v218_v35 = vpop.permute.xlu0 %217 }
 0x12b   :  { %v220_v36 = vmul.f32 %v218_v35, %v212_v33 }
 0x197   :  { %v228_v37 = vpop.permute.xlu1 %227 }
 0x198   :  { %v230_v38 = vadd.f32 %v228_v37, %v220_v36 }
 0x19a   :  { %978 = vtanh.f32 %v230_v38 }
 0x1a0   :  { %v979_v39 = vpop.eup %978 }
 0x1a1   :  { %233 = vrot.lane.b32.xlu1 %v979_v39, %s1240_s1 }
 0x213   :  { %v234_v40 = vpop.permute.xlu1 %233 }
 0x214   :  { %v1329_v41 = vmul.f32 %v234_v40, %v212_v33 }
 0x216   :  { %238 = vrot.lane.b32.xlu2 %v1329_v41, %s1245_s29 }
 0x21e   :  { %244 = vrot.lane.b32.xlu2 %v230_v38, %s1246_s5 }
 0x270   :  { %v239_v42 = vpop.permute.xlu2 %238 }
 0x271   :  { %242 = vst.msk [vmem:[#allocation3] sm:$0x3] %vm108_vm0, %v239_v42 }
 0x278   :  { %v245_v43 = vpop.permute.xlu2 %244  ;;  %v263_v44 = vld [vmem:[#allocation3] sm:$0x3] }
 0x279   :  { %247 = vst.msk [vmem:[#allocation4] sm:$0x3] %vm108_vm0, %v245_v43  ;;  %v264_v45 = vpack.c.bf16 %v263_v44, %v263_v44 }
 0x27b   :  { %938 = vmatmul.msk.bf16.vlgmr.msra.gmra.mxu2 %vm139_vm1, %v264_v45 }
 0x280   :  { %v302_v46 = vld [vmem:[#allocation4] sm:$0x3] }
 0x281   :  { %304 = vrot.lane.b32.xlu1 %v302_v46, %s1245_s29 }
 0x2f3   :  { %v305_v3 = vpop.permute.xlu1 %304 }
 0x2fe   :  { %v277_v48 = vpop.f32.mrf.mxu2 }
 0x2ff   :  { %v281_v49 = vadd.f32 %v277_v48, %v262_v47  ;;  %v432_v48 = vld [vmem:[#allocation2 + $0x6] sm:$0x3] }
 0x301   :  { %980 = vtanh.f32 %v281_v49  ;;  %v939_v52 = vmul.f32 -1.442695, %v281_v49 }
 0x303   :  { %982 = vpow2.f32 %v939_v52 }
 0x306   :  { %v279_v50 = vpop.f32.mrf.mxu2 }
 0x307   :  { %v981_v51 = vpop.eup %980 }
 0x308   :  { %309 = vrot.lane.b32.xlu0 %v981_v51, %s1240_s1 }
 0x309   :  { %v983_v53 = vpop.eup %982 }
 0x30a   :  { %v285_v54 = vadd.f32 1.0, %v983_v53 }
 0x30c   :  { %984 = vrcp.f32 %v285_v54  ;;  %v297_v60 = vand.u32 2147483648, %v285_v54  ;;  %vm291_vm7 = vweird.f32 %v285_v54  ;;  %v295_v61 = vand.u32 2147483647, %v285_v54 }
 0x30e   :  { %v298_v63 = vor.u32 1.1754944e-38, %v297_v60  ;;  %vm296_vm9 = vcmp.eq.f32.partialorder %v295_v61, 8.507059e+37 }
 0x312   :  { %v985_v55 = vpop.eup %984 }
 0x313   :  { %v287_v56 = vmul.f32 %v985_v55, %v285_v54  ;;  %vm292_vm6 = vweird.f32 %v985_v55 }
 0x314   :  { %vm293_vm8 = vmor %vm291_vm7, %vm292_vm6 }
 0x315   :  { %v288_v57 = vsub.f32 1.0, %v287_v56 }
 0x317   :  { %v289_v58 = vmul.f32 %v985_v55, %v288_v57 }
 0x319   :  { %v290_v59 = vadd.f32 %v985_v55, %v289_v58 }
 0x31b   :  { %v294_v62 = vsel %vm293_vm8, %v985_v55, %v290_v59 }
 0x31c   :  { %v299_v1 = vsel %vm296_vm9, %v298_v63, %v294_v62 }
 0x31d   :  { %v307_v4 = vmul.f32 %v305_v3, %v299_v1 }
 0x37a   :  { %v310_v0 = vpop.permute.xlu0 %309 }
 0x37b   :  { %v312_v2 = vmul.f32 %v310_v0, %v299_v1 }
 0x37d   :  { %314 = vrot.lane.b32.xlu2 %v312_v2, %s1245_s29 }
 0x3d7   :  { %v315_v5 = vpop.permute.xlu2 %314 }
 0x3d8   :  { %v317_v6 = vadd.f32 %v315_v5, %v307_v4 }
 0x3da   :  { %986 = vtanh.f32 %v317_v6  ;;  %330 = vrot.lane.b32.xlu2 %v317_v6, %s1246_s5 }
 0x3e0   :  { %v987_v7 = vpop.eup %986 }
 0x3e1   :  { %320 = vrot.lane.b32.xlu0 %v987_v7, %s1240_s1 }
 0x434   :  { %v331_v8 = vpop.permute.xlu2 %330 }
 0x435   :  { %333 = vst.msk [vmem:[#allocation4] sm:$0x3] %vm108_vm0, %v331_v8 }
 0x43c   :  { %v387_v11 = vld [vmem:[#allocation4] sm:$0x3] }
 0x453   :  { %v321_v9 = vpop.permute.xlu0 %320 }
 0x454   :  { %v1343_v10 = vmul.f32 %v321_v9, %v299_v1 }
 0x456   :  { %325 = vrot.lane.b32.xlu1 %v1343_v10, %s1245_s29 }
 0x45e   :  { %389 = vrot.lane.b32.xlu1 %v387_v11, %s1245_s29 }
 0x4c8   :  { %v326_v12 = vpop.permute.xlu1 %325 }
 0x4c9   :  { %328 = vst.msk [vmem:[#allocation3] sm:$0x3] %vm108_vm0, %v326_v12 }
 0x4d0   :  { %v348_v13 = vld [vmem:[#allocation3] sm:$0x3]  ;;  %v390_v35 = vpop.permute.xlu1 %389 }
 0x4d1   :  { %v349_v14 = vpack.c.bf16 %v348_v13, %v348_v13 }
 0x4d3   :  { %940 = vmatmul.msk.bf16.vlgmr.msra.gmra.mxu3 %vm139_vm1, %v349_v14 }
 0x556   :  { %v362_v16 = vpop.f32.mrf.mxu3 }
 0x557   :  { %v366_v17 = vadd.f32 %v362_v16, %v347_v15 }
 0x559   :  { %988 = vtanh.f32 %v366_v17  ;;  %v941_v20 = vmul.f32 -1.442695, %v366_v17  ;;  %v517_v17 = vld [vmem:[#allocation2 + $0x8] sm:$0x3] }
 0x55b   :  { %990 = vpow2.f32 %v941_v20 }
 0x55e   :  { %v364_v18 = vpop.f32.mrf.mxu3 }
 0x55f   :  { %v989_v19 = vpop.eup %988 }
 0x560   :  { %394 = vrot.lane.b32.xlu0 %v989_v19, %s1240_s1 }
 0x561   :  { %v991_v21 = vpop.eup %990 }
 0x562   :  { %v370_v22 = vadd.f32 1.0, %v991_v21 }
 0x564   :  { %992 = vrcp.f32 %v370_v22  ;;  %v382_v28 = vand.u32 2147483648, %v370_v22  ;;  %vm376_vm11 = vweird.f32 %v370_v22  ;;  %v380_v29 = vand.u32 2147483647, %v370_v22 }
 0x566   :  { %v383_v31 = vor.u32 1.1754944e-38, %v382_v28  ;;  %vm381_vm13 = vcmp.eq.f32.partialorder %v380_v29, 8.507059e+37 }
 0x56a   :  { %v993_v23 = vpop.eup %992 }
 0x56b   :  { %v372_v24 = vmul.f32 %v993_v23, %v370_v22  ;;  %vm377_vm10 = vweird.f32 %v993_v23 }
 0x56c   :  { %vm378_vm12 = vmor %vm376_vm11, %vm377_vm10 }
 0x56d   :  { %v373_v25 = vsub.f32 1.0, %v372_v24 }
 0x56f   :  { %v374_v26 = vmul.f32 %v993_v23, %v373_v25 }
 0x571   :  { %v375_v27 = vadd.f32 %v993_v23, %v374_v26 }
 0x573   :  { %v379_v30 = vsel %vm378_vm12, %v993_v23, %v375_v27 }
 0x574   :  { %v384_v33 = vsel %vm381_vm13, %v383_v31, %v379_v30 }
 0x575   :  { %v392_v36 = vmul.f32 %v390_v35, %v384_v33 }
 0x5d2   :  { %v395_v32 = vpop.permute.xlu0 %394 }
 0x5d3   :  { %v397_v34 = vmul.f32 %v395_v32, %v384_v33 }
 0x5d5   :  { %399 = vrot.lane.b32.xlu2 %v397_v34, %s1245_s29 }
 0x62f   :  { %v400_v37 = vpop.permute.xlu2 %399 }
 0x630   :  { %v402_v38 = vadd.f32 %v400_v37, %v392_v36 }
 0x632   :  { %994 = vtanh.f32 %v402_v38  ;;  %415 = vrot.lane.b32.xlu2 %v402_v38, %s1246_s5 }
 0x638   :  { %v995_v39 = vpop.eup %994 }
 0x639   :  { %405 = vrot.lane.b32.xlu0 %v995_v39, %s1240_s1 }
 0x68c   :  { %v416_v40 = vpop.permute.xlu2 %415 }
 0x68d   :  { %418 = vst.msk [vmem:[#allocation4] sm:$0x3] %vm108_vm0, %v416_v40 }
 0x694   :  { %v472_v44 = vld [vmem:[#allocation4] sm:$0x3] }
 0x6ab   :  { %v406_v42 = vpop.permute.xlu0 %405 }
 0x6ac   :  { %v1355_v43 = vmul.f32 %v406_v42, %v384_v33 }
 0x6ae   :  { %410 = vrot.lane.b32.xlu1 %v1355_v43, %s1245_s29 }
 0x6b6   :  { %474 = vrot.lane.b32.xlu1 %v472_v44, %s1245_s29 }
 0x720   :  { %v411_v45 = vpop.permute.xlu1 %410 }
 0x721   :  { %413 = vst.msk [vmem:[#allocation3] sm:$0x3] %vm108_vm0, %v411_v45 }
 0x728   :  { %v433_v46 = vld [vmem:[#allocation3] sm:$0x3]  ;;  %v475_v4 = vpop.permute.xlu1 %474 }
 0x729   :  { %v434_v47 = vpack.c.bf16 %v433_v46, %v433_v46 }
 0x72b   :  { %942 = vmatmul.msk.bf16.vlgmr.msrb.gmra.mxu0 %vm139_vm1, %v434_v47 }
 0x7a8   :  { %v447_v49 = vpop.f32.mrf.mxu0 }
 0x7a9   :  { %v451_v50 = vadd.f32 %v447_v49, %v432_v48 }
 0x7ab   :  { %996 = vtanh.f32 %v451_v50  ;;  %v943_v53 = vmul.f32 -1.442695, %v451_v50 }
 0x7ad   :  { %998 = vpow2.f32 %v943_v53 }
 0x7b0   :  { %v449_v51 = vpop.f32.mrf.mxu0 }
 0x7b1   :  { %v997_v52 = vpop.eup %996  ;;  %v602_v51 = vld [vmem:[#allocation2 + $0xa] sm:$0x3] }
 0x7b2   :  { %479 = vrot.lane.b32.xlu0 %v997_v52, %s1240_s1 }
 0x7b3   :  { %v999_v54 = vpop.eup %998 }
 0x7b4   :  { %v455_v55 = vadd.f32 1.0, %v999_v54 }
 0x7b6   :  { %1000 = vrcp.f32 %v455_v55  ;;  %v467_v61 = vand.u32 2147483648, %v455_v55  ;;  %vm461_vm15 = vweird.f32 %v455_v55  ;;  %v465_v62 = vand.u32 2147483647, %v455_v55 }
 0x7b8   :  { %v468_v0 = vor.u32 1.1754944e-38, %v467_v61  ;;  %vm466_vm3 = vcmp.eq.f32.partialorder %v465_v62, 8.507059e+37 }
 0x7bc   :  { %v1001_v56 = vpop.eup %1000 }
 0x7bd   :  { %v457_v57 = vmul.f32 %v1001_v56, %v455_v55  ;;  %vm462_vm14 = vweird.f32 %v1001_v56 }
 0x7be   :  { %vm463_vm2 = vmor %vm461_vm15, %vm462_vm14 }
 0x7bf   :  { %v458_v58 = vsub.f32 1.0, %v457_v57 }
 0x7c1   :  { %v459_v59 = vmul.f32 %v1001_v56, %v458_v58 }
 0x7c3   :  { %v460_v60 = vadd.f32 %v1001_v56, %v459_v59 }
 0x7c5   :  { %v464_v63 = vsel %vm463_vm2, %v1001_v56, %v460_v60  ;;  %vm251_vm2 = vcmask 1040384  }
 0x7c6   :  { %v469_v2 = vsel %vm466_vm3, %v468_v0, %v464_v63  ;;  %vm259_vm3 = vcmask 253952  }
 0x7c7   :  { %v477_v5 = vmul.f32 %v475_v4, %v469_v2 }
 0x824   :  { %v480_v1 = vpop.permute.xlu0 %479 }
 0x825   :  { %v482_v3 = vmul.f32 %v480_v1, %v469_v2 }
 0x827   :  { %484 = vrot.lane.b32.xlu2 %v482_v3, %s1245_s29 }
 0x881   :  { %v485_v6 = vpop.permute.xlu2 %484 }
 0x882   :  { %v487_v7 = vadd.f32 %v485_v6, %v477_v5 }
 0x884   :  { %1002 = vtanh.f32 %v487_v7  ;;  %500 = vrot.lane.b32.xlu2 %v487_v7, %s1246_s5 }
 0x88a   :  { %v1003_v8 = vpop.eup %1002 }
 0x88b   :  { %490 = vrot.lane.b32.xlu0 %v1003_v8, %s1240_s1 }
 0x8de   :  { %v501_v9 = vpop.permute.xlu2 %500 }
 0x8df   :  { %503 = vst.msk [vmem:[#allocation4] sm:$0x3] %vm108_vm0, %v501_v9 }
 0x8e6   :  { %v557_v13 = vld [vmem:[#allocation4] sm:$0x3] }
 0x8fd   :  { %v491_v11 = vpop.permute.xlu0 %490 }
 0x8fe   :  { %v1367_v12 = vmul.f32 %v491_v11, %v469_v2 }
 0x900   :  { %495 = vrot.lane.b32.xlu1 %v1367_v12, %s1245_s29 }
 0x908   :  { %559 = vrot.lane.b32.xlu1 %v557_v13, %s1245_s29 }
 0x972   :  { %v496_v14 = vpop.permute.xlu1 %495 }
 0x973   :  { %498 = vst.msk [vmem:[#allocation3] sm:$0x3] %vm108_vm0, %v496_v14 }
 0x97a   :  { %v518_v15 = vld [vmem:[#allocation3] sm:$0x3]  ;;  %v560_v37 = vpop.permute.xlu1 %559 }
 0x97b   :  { %v519_v16 = vpack.c.bf16 %v518_v15, %v518_v15 }
 0x97d   :  { %944 = vmatmul.msk.bf16.vlgmr.msrb.gmra.mxu1 %vm139_vm1, %v519_v16 }
 0x9fa   :  { %v532_v18 = vpop.f32.mrf.mxu1 }
 0x9fb   :  { %v536_v19 = vadd.f32 %v532_v18, %v517_v17 }
 0x9fd   :  { %1004 = vtanh.f32 %v536_v19  ;;  %v945_v22 = vmul.f32 -1.442695, %v536_v19 }
 0x9ff   :  { %1006 = vpow2.f32 %v945_v22 }
 0xa02   :  { %v534_v20 = vpop.f32.mrf.mxu1 }
 0xa03   :  { %v1005_v21 = vpop.eup %1004 }
 0xa04   :  { %564 = vrot.lane.b32.xlu0 %v1005_v21, %s1240_s1  ;;  %v687_v21 = vld [vmem:[#allocation2 + $0xc] sm:$0x3] }
 0xa05   :  { %v1007_v23 = vpop.eup %1006 }
 0xa06   :  { %v540_v24 = vadd.f32 1.0, %v1007_v23 }
 0xa08   :  { %1008 = vrcp.f32 %v540_v24  ;;  %v552_v30 = vand.u32 2147483648, %v540_v24  ;;  %vm546_vm5 = vweird.f32 %v540_v24  ;;  %v550_v31 = vand.u32 2147483647, %v540_v24 }
 0xa0a   :  { %v553_v33 = vor.u32 1.1754944e-38, %v552_v30  ;;  %vm551_vm7 = vcmp.eq.f32.partialorder %v550_v31, 8.507059e+37 }
 0xa0e   :  { %v1009_v25 = vpop.eup %1008 }
 0xa0f   :  { %v542_v26 = vmul.f32 %v1009_v25, %v540_v24  ;;  %vm547_vm4 = vweird.f32 %v1009_v25 }
 0xa10   :  { %vm548_vm6 = vmor %vm546_vm5, %vm547_vm4 }
 0xa11   :  { %v543_v27 = vsub.f32 1.0, %v542_v26 }
 0xa13   :  { %v544_v28 = vmul.f32 %v1009_v25, %v543_v27 }
 0xa15   :  { %v545_v29 = vadd.f32 %v1009_v25, %v544_v28 }
 0xa17   :  { %v549_v32 = vsel %vm548_vm6, %v1009_v25, %v545_v29 }
 0xa18   :  { %v554_v35 = vsel %vm551_vm7, %v553_v33, %v549_v32 }
 0xa19   :  { %v562_v38 = vmul.f32 %v560_v37, %v554_v35 }
 0xa76   :  { %v565_v34 = vpop.permute.xlu0 %564 }
 0xa77   :  { %v567_v36 = vmul.f32 %v565_v34, %v554_v35 }
 0xa79   :  { %569 = vrot.lane.b32.xlu2 %v567_v36, %s1245_s29 }
 0xad3   :  { %v570_v39 = vpop.permute.xlu2 %569 }
 0xad4   :  { %v572_v40 = vadd.f32 %v570_v39, %v562_v38 }
 0xad6   :  { %1010 = vtanh.f32 %v572_v40  ;;  %585 = vrot.lane.b32.xlu2 %v572_v40, %s1246_s5 }
 0xadc   :  { %v1011_v42 = vpop.eup %1010 }
 0xadd   :  { %575 = vrot.lane.b32.xlu0 %v1011_v42, %s1240_s1 }
 0xb30   :  { %v586_v44 = vpop.permute.xlu2 %585 }
 0xb31   :  { %588 = vst.msk [vmem:[#allocation4] sm:$0x3] %vm108_vm0, %v586_v44 }
 0xb38   :  { %v642_v47 = vld [vmem:[#allocation4] sm:$0x3] }
 0xb4f   :  { %v576_v45 = vpop.permute.xlu0 %575 }
 0xb50   :  { %v1379_v46 = vmul.f32 %v576_v45, %v554_v35 }
 0xb52   :  { %580 = vrot.lane.b32.xlu1 %v1379_v46, %s1245_s29 }
 0xb5a   :  { %644 = vrot.lane.b32.xlu1 %v642_v47, %s1245_s29 }
 0xbc4   :  { %v581_v48 = vpop.permute.xlu1 %580 }
 0xbc5   :  { %583 = vst.msk [vmem:[#allocation3] sm:$0x3] %vm108_vm0, %v581_v48 }
 0xbcc   :  { %v603_v49 = vld [vmem:[#allocation3] sm:$0x3]  ;;  %v645_v7 = vpop.permute.xlu1 %644 }
 0xbcd   :  { %v604_v50 = vpack.c.bf16 %v603_v49, %v603_v49 }
 0xbcf   :  { %946 = vmatmul.msk.bf16.vlgmr.msrb.gmra.mxu2 %vm139_vm1, %v604_v50 }
 0xc52   :  { %v617_v52 = vpop.f32.mrf.mxu2 }
 0xc53   :  { %v621_v53 = vadd.f32 %v617_v52, %v602_v51  ;;  %v334_v52 = vpack.c.bf16 %v1343_v10, %v1343_v10  ;;  %v772_v10 = vld [vmem:[#allocation2 + $0xe] sm:$0x3] }
 0xc55   :  { %1012 = vtanh.f32 %v621_v53  ;;  %v947_v56 = vmul.f32 -1.442695, %v621_v53 }
 0xc57   :  { %1014 = vpow2.f32 %v947_v56 }
 0xc5a   :  { %v619_v54 = vpop.f32.mrf.mxu2 }
 0xc5b   :  { %v1013_v55 = vpop.eup %1012  ;;  %v336_v54 = vrot.slane %v334_v52, 3 }
 0xc5c   :  { %649 = vrot.lane.b32.xlu0 %v1013_v55, %s1240_s1 }
 0xc5d   :  { %v1015_v57 = vpop.eup %1014  ;;  %v339_v55 = vsel %vm251_vm2, %v334_v52, %v336_v54 }
 0xc5e   :  { %v625_v58 = vadd.f32 1.0, %v1015_v57 }
 0xc60   :  { %1016 = vrcp.f32 %v625_v58  ;;  %v637_v0 = vand.u32 2147483648, %v625_v58  ;;  %vm631_vm9 = vweird.f32 %v625_v58  ;;  %v635_v1 = vand.u32 2147483647, %v625_v58 }
 0xc62   :  { %v638_v3 = vor.u32 1.1754944e-38, %v637_v0  ;;  %vm636_vm11 = vcmp.eq.f32.partialorder %v635_v1, 8.507059e+37 }
 0xc66   :  { %v1017_v59 = vpop.eup %1016 }
 0xc67   :  { %v627_v60 = vmul.f32 %v1017_v59, %v625_v58  ;;  %vm632_vm8 = vweird.f32 %v1017_v59 }
 0xc68   :  { %vm633_vm10 = vmor %vm631_vm9, %vm632_vm8 }
 0xc69   :  { %v628_v61 = vsub.f32 1.0, %v627_v60 }
 0xc6b   :  { %v629_v62 = vmul.f32 %v1017_v59, %v628_v61 }
 0xc6d   :  { %v630_v63 = vadd.f32 %v1017_v59, %v629_v62 }
 0xc6f   :  { %v634_v2 = vsel %vm633_vm10, %v1017_v59, %v630_v63 }
 0xc70   :  { %v639_v5 = vsel %vm636_vm11, %v638_v3, %v634_v2 }
 0xc71   :  { %v647_v8 = vmul.f32 %v645_v7, %v639_v5 }
 0xcce   :  { %v650_v4 = vpop.permute.xlu0 %649 }
 0xccf   :  { %v652_v6 = vmul.f32 %v650_v4, %v639_v5 }
 0xcd1   :  { %654 = vrot.lane.b32.xlu2 %v652_v6, %s1245_s29 }
 0xd2b   :  { %v655_v9 = vpop.permute.xlu2 %654 }
 0xd2c   :  { %v657_v11 = vadd.f32 %v655_v9, %v647_v8 }
 0xd2e   :  { %1018 = vtanh.f32 %v657_v11  ;;  %670 = vrot.lane.b32.xlu2 %v657_v11, %s1246_s5 }
 0xd34   :  { %v1019_v13 = vpop.eup %1018 }
 0xd35   :  { %660 = vrot.lane.b32.xlu0 %v1019_v13, %s1240_s1 }
 0xd88   :  { %v671_v14 = vpop.permute.xlu2 %670 }
 0xd89   :  { %673 = vst.msk [vmem:[#allocation4] sm:$0x3] %vm108_vm0, %v671_v14 }
 0xd90   :  { %v727_v17 = vld [vmem:[#allocation4] sm:$0x3] }
 0xda7   :  { %v661_v15 = vpop.permute.xlu0 %660 }
 0xda8   :  { %v1391_v16 = vmul.f32 %v661_v15, %v639_v5 }
 0xdaa   :  { %665 = vrot.lane.b32.xlu1 %v1391_v16, %s1245_s29 }
 0xdb2   :  { %729 = vrot.lane.b32.xlu1 %v727_v17, %s1245_s29 }
 0xe1c   :  { %v666_v18 = vpop.permute.xlu1 %665 }
 0xe1d   :  { %668 = vst.msk [vmem:[#allocation3] sm:$0x3] %vm108_vm0, %v666_v18 }
 0xe24   :  { %v688_v19 = vld [vmem:[#allocation3] sm:$0x3]  ;;  %v730_v42 = vpop.permute.xlu1 %729 }
 0xe25   :  { %v689_v20 = vpack.c.bf16 %v688_v19, %v688_v19 }
 0xe27   :  { %948 = vmatmul.msk.bf16.vlgmr.msrb.gmra.mxu3 %vm139_vm1, %v689_v20 }
 0xeaa   :  { %v702_v22 = vpop.f32.mrf.mxu3 }
 0xeab   :  { %v706_v23 = vadd.f32 %v702_v22, %v687_v21  ;;  %v419_v22 = vpack.c.bf16 %v1355_v43, %v1355_v43  ;;  %v504_v43 = vpack.c.bf16 %v1367_v12, %v1367_v12 }
 0xead   :  { %1020 = vtanh.f32 %v706_v23  ;;  %v949_v26 = vmul.f32 -1.442695, %v706_v23  ;;  %v421_v23 = vrot.slane %v419_v22, 3 }
 0xeaf   :  { %1022 = vpow2.f32 %v949_v26  ;;  %v674_v26 = vpack.c.bf16 %v1391_v16, %v1391_v16  ;;  %v506_v16 = vrot.slane %v504_v43, 3 }
 0xeb2   :  { %v704_v24 = vpop.f32.mrf.mxu3 }
 0xeb3   :  { %v1021_v25 = vpop.eup %1020 }
 0xeb4   :  { %734 = vrot.lane.b32.xlu0 %v1021_v25, %s1240_s1  ;;  %v248_v25 = vpack.c.bf16 %v1329_v41, %v1329_v41 }
 0xeb5   :  { %v1023_v27 = vpop.eup %1022 }
 0xeb6   :  { %v710_v28 = vadd.f32 1.0, %v1023_v27  ;;  %v424_v27 = vsel %vm251_vm2, %v419_v22, %v421_v23 }
 0xeb8   :  { %1024 = vrcp.f32 %v710_v28  ;;  %v722_v34 = vand.u32 2147483648, %v710_v28  ;;  %vm716_vm13 = vweird.f32 %v710_v28  ;;  %v720_v35 = vand.u32 2147483647, %v710_v28 }
 0xeba   :  { %v723_v37 = vor.u32 1.1754944e-38, %v722_v34  ;;  %vm721_vm15 = vcmp.eq.f32.partialorder %v720_v35, 8.507059e+37 }
 0xebe   :  { %v1025_v29 = vpop.eup %1024 }
 0xebf   :  { %v712_v30 = vmul.f32 %v1025_v29, %v710_v28  ;;  %vm717_vm12 = vweird.f32 %v1025_v29  ;;  %v250_v28 = vrot.slane %v248_v25, 3 }
 0xec0   :  { %vm718_vm14 = vmor %vm716_vm13, %vm717_vm12 }
 0xec1   :  { %v713_v31 = vsub.f32 1.0, %v712_v30  ;;  %v254_v30 = vsel %vm251_vm2, %v248_v25, %v250_v28 }
 0xec3   :  { %v714_v32 = vmul.f32 %v1025_v29, %v713_v31 }
 0xec5   :  { %v715_v33 = vadd.f32 %v1025_v29, %v714_v32  ;;  %v509_v32 = vsel %vm251_vm2, %v504_v43, %v506_v16 }
 0xec7   :  { %v719_v36 = vsel %vm718_vm14, %v1025_v29, %v715_v33  ;;  %v676_v29 = vrot.slane %v674_v26, 3 }
 0xec8   :  { %v724_v39 = vsel %vm721_vm15, %v723_v37, %v719_v36 }
 0xec9   :  { %v732_v44 = vmul.f32 %v730_v42, %v724_v39  ;;  %v679_v41 = vsel %vm251_vm2, %v674_v26, %v676_v29 }
 0xf26   :  { %v735_v38 = vpop.permute.xlu0 %734 }
 0xf27   :  { %v737_v40 = vmul.f32 %v735_v38, %v724_v39 }
 0xf29   :  { %739 = vrot.lane.b32.xlu2 %v737_v40, %s1245_s29  ;;  %v589_v40 = vpack.c.bf16 %v1379_v46, %v1379_v46 }
 0xf2b   :  { %v591_v42 = vrot.slane %v589_v40, 3 }
 0xf83   :  { %v740_v45 = vpop.permute.xlu2 %739 }
 0xf84   :  { %v742_v47 = vadd.f32 %v740_v45, %v732_v44 }
 0xf86   :  { %1026 = vtanh.f32 %v742_v47  ;;  %755 = vrot.lane.b32.xlu2 %v742_v47, %s1246_s5  ;;  %v594_v47 = vsel %vm251_vm2, %v589_v40, %v591_v42 }
 0xf8c   :  { %v1027_v48 = vpop.eup %1026 }
 0xf8d   :  { %745 = vrot.lane.b32.xlu0 %v1027_v48, %s1240_s1 }
 0xfe0   :  { %v756_v49 = vpop.permute.xlu2 %755 }
 0xfe1   :  { %758 = vst.msk [vmem:[#allocation4] sm:$0x3] %vm108_vm0, %v756_v49 }
 0xfe8   :  { %v812_v53 = vld [vmem:[#allocation4] sm:$0x3] }
 0xfff   :  { %v746_v50 = vpop.permute.xlu0 %745 }
0x1000   :  { %v1403_v51 = vmul.f32 %v746_v50, %v724_v39 }
0x1002   :  { %750 = vrot.lane.b32.xlu1 %v1403_v51, %s1245_s29  ;;  %v759_v31 = vpack.c.bf16 %v1403_v51, %v1403_v51 }
0x1004   :  { %v761_v33 = vrot.slane %v759_v31, 3 }
0x1006   :  { %v764_v34 = vsel %vm251_vm2, %v759_v31, %v761_v33 }
0x100a   :  { %814 = vrot.lane.b32.xlu1 %v812_v53, %s1245_s29 }
0x1012   :  { %341 = vrot.lane.b32.xlu1 %v339_v55, %s1245_s29 }
0x1074   :  { %v751_v56 = vpop.permute.xlu1 %750 }
0x1075   :  { %753 = vst.msk [vmem:[#allocation3] sm:$0x3] %vm108_vm0, %v751_v56 }
0x107c   :  { %v815_v57 = vpop.permute.xlu1 %814  ;;  %v773_v58 = vld [vmem:[#allocation3] sm:$0x3] }
0x107d   :  { %v774_v59 = vpack.c.bf16 %v773_v58, %v773_v58 }
0x107f   :  { %950 = vmatmul.msk.bf16.vlgmr.msra.gmra.mxu0 %vm139_vm1, %v774_v59 }
0x1084   :  { %v342_v60 = vpop.permute.xlu1 %341 }
0x1085   :  { %345 = vst.msk [vmem:[#allocation14 + $0x1] sm:$0x1] %vm259_vm3, %v342_v60 }
0x10fc   :  { %v787_v61 = vpop.f32.mrf.mxu0 }
0x10fd   :  { %v791_v62 = vadd.f32 %v787_v61, %v772_v10 }
0x10ff   :  { %1028 = vtanh.f32 %v791_v62  ;;  %v951_v1 = vmul.f32 -1.442695, %v791_v62 }
0x1101   :  { %1030 = vpow2.f32 %v951_v1 }
0x1104   :  { %v789_v63 = vpop.f32.mrf.mxu0 }
0x1105   :  { %v1029_v0 = vpop.eup %1028 }
0x1106   :  { %819 = vrot.lane.b32.xlu0 %v1029_v0, %s1240_s1 }
0x1107   :  { %v1031_v2 = vpop.eup %1030 }
0x1108   :  { %v795_v3 = vadd.f32 1.0, %v1031_v2 }
0x110a   :  { %1032 = vrcp.f32 %v795_v3  ;;  %v807_v9 = vand.u32 2147483648, %v795_v3  ;;  %vm801_vm4 = vweird.f32 %v795_v3  ;;  %v805_v11 = vand.u32 2147483647, %v795_v3 }
0x110c   :  { %v808_v14 = vor.u32 1.1754944e-38, %v807_v9  ;;  %vm806_vm6 = vcmp.eq.f32.partialorder %v805_v11, 8.507059e+37 }
0x1110   :  { %v1033_v4 = vpop.eup %1032 }
0x1111   :  { %v797_v5 = vmul.f32 %v1033_v4, %v795_v3  ;;  %vm802_vm1 = vweird.f32 %v1033_v4 }
0x1112   :  { %vm803_vm5 = vmor %vm801_vm4, %vm802_vm1 }
0x1113   :  { %v798_v6 = vsub.f32 1.0, %v797_v5 }
0x1115   :  { %v799_v7 = vmul.f32 %v1033_v4, %v798_v6 }
0x1117   :  { %v800_v8 = vadd.f32 %v1033_v4, %v799_v7 }
0x1119   :  { %v804_v13 = vsel %vm803_vm5, %v1033_v4, %v800_v8 }
0x111a   :  { %v809_v17 = vsel %vm806_vm6, %v808_v14, %v804_v13 }
0x111b   :  { %v817_v19 = vmul.f32 %v815_v57, %v809_v17 }
0x1178   :  { %v820_v15 = vpop.permute.xlu0 %819 }
0x1179   :  { %v822_v18 = vmul.f32 %v820_v15, %v809_v17 }
0x117b   :  { %824 = vrot.lane.b32.xlu2 %v822_v18, %s1245_s29 }
0x11d5   :  { %v825_v20 = vpop.permute.xlu2 %824 }
0x11d6   :  { %v827_v21 = vadd.f32 %v825_v20, %v817_v19 }
0x11d8   :  { %1034 = vtanh.f32 %v827_v21  ;;  %840 = vrot.lane.b32.xlu2 %v827_v21, %s1246_s5 }
0x11de   :  { %v1035_v24 = vpop.eup %1034 }
0x11df   :  { %830 = vrot.lane.b32.xlu0 %v1035_v24, %s1240_s1  ;;  %s1249_s1 = smov [#allocation14]  }
0x11e0   :  { %426 = vrot.lane.b32.xlu2 %v424_v27, %s1245_s29  ;;  %s867_s18 = sshll.u32 %s1249_s1, 4  ;;  %s868_s18 = int_to_ptr.vmem [resolvable:$true] %s867_s18 }
0x11e7   :  { %256 = vrot.lane.b32.xlu0 %v254_v30, %s1245_s29 }
0x11e8   :  { %681 = vrot.lane.b32.xlu2 %v679_v41, %s1245_s29 }
0x11ef   :  { %511 = vrot.lane.b32.xlu0 %v509_v32, %s1245_s29 }
0x11f7   :  { %766 = vrot.lane.b32.xlu0 %v764_v34, %s1245_s29 }
0x1232   :  { %v841_v12 = vpop.permute.xlu2 %840 }
0x1233   :  { %843 = vst.msk [vmem:[#allocation4] sm:$0x3] %vm108_vm0, %v841_v12 }
0x123a   :  { %v427_v35 = vpop.permute.xlu2 %426  ;;  %v861_v36 = vld [vmem:[#allocation4] sm:$0x3] }
0x123b   :  { %430 = vst.msk [vmem:[#allocation14 + $0x2] sm:$0x1] %vm259_vm3, %v427_v35 }
0x123c   :  { %862 = vst.msk [vmem:[#allocation17] sm:$0x3] %vm108_vm0, %v861_v36 }
0x1242   :  { %v682_v37 = vpop.permute.xlu2 %681 }
0x1243   :  { %685 = vst.msk [vmem:[#allocation14 + $0x5] sm:$0x1] %vm259_vm3, %v682_v37 }
0x1251   :  { %v831_v38 = vpop.permute.xlu0 %830 }
0x1252   :  { %v833_v39 = vmul.f32 %v831_v38, %v809_v17 }
0x1254   :  { %835 = vrot.lane.b32.xlu1 %v833_v39, %s1245_s29  ;;  %v844_v45 = vpack.c.bf16 %v833_v39, %v833_v39 }
0x1256   :  { %v846_v48 = vrot.slane %v844_v45, 3 }
0x1258   :  { %v849_v50 = vsel %vm251_vm2, %v844_v45, %v846_v48 }
0x1259   :  { %v257_v44 = vpop.permute.xlu0 %256 }
0x125a   :  { %260 = vst.msk [vmem:[#allocation14] sm:$0x1] %vm259_vm3, %v257_v44 }
0x125c   :  { %596 = vrot.lane.b32.xlu1 %v594_v47, %s1245_s29 }
0x1261   :  { %v512_v49 = vpop.permute.xlu0 %511 }
0x1262   :  { %515 = vst.msk [vmem:[#allocation14 + $0x3] sm:$0x1] %vm259_vm3, %v512_v49 }
0x1264   :  { %851 = vrot.lane.b32.xlu1 %v849_v50, %s1245_s29 }
0x1269   :  { %v767_v46 = vpop.permute.xlu0 %766 }
0x126a   :  { %770 = vst.msk [vmem:[#allocation14 + $0x6] sm:$0x1] %vm259_vm3, %v767_v46 }
0x12c6   :  { %v836_v51 = vpop.permute.xlu1 %835 }
0x12c7   :  { %838 = vst.msk [vmem:[#allocation3] sm:$0x3] %vm108_vm0, %v836_v51 }
0x12ce   :  { %v597_v52 = vpop.permute.xlu1 %596  ;;  %v859_v53 = vld [vmem:[#allocation3] sm:$0x3] }
0x12cf   :  { %600 = vst.msk [vmem:[#allocation14 + $0x4] sm:$0x1] %vm259_vm3, %v597_v52 }
0x12d0   :  { %860 = vst.msk [vmem:[#allocation15] sm:$0x3] %vm108_vm0, %v859_v53 }
0x12d1   :  { %886 = dma.vmem_to_hbm [thread:$0]  %s882_s9, 32, %s884_s12, [#allocation16]  }
0x12d2   :  { %897 = dma.vmem_to_hbm [thread:$0]  %s893_s14, 32, %s895_s17, [#allocation16]  }
0x12d6   :  { %v852_v54 = vpop.permute.xlu1 %851 }
0x12d7   :  { %855 = vst.msk [vmem:[#allocation14 + $0x7] sm:$0x1] %vm259_vm3, %v852_v54 }
0x12d8   :  { %875 = dma.vmem_to_hbm [thread:$0]  %s868_s18, 128, %s870_s20, [#allocation7], %s1250_s8, %s1250_s8, %s1251_s21  }
0x12d9   :  { %1234 = dma.done.wait [#allocation7], 128  }
0x12da   :  { %1235 = vsyncadd [#allocation7], 4294967168 }
0x12db   :  { %1236 = dma.done.wait [#allocation16], 64  }
0x12dc   :  { %1237 = vsyncadd [#allocation16], 4294967232 }
0x12dd   :  { %910 = vsyncpa [#allocation6], 1 }
0x12de   :  { %911 = vsyncpa [#allocation9], 1 }
0x12df   :  { %912 = vsyncpa [#allocation12], 1 }
0x12e0   :  { %913 = vsyncpa [#allocation7], 1 }
0x12e1   :  { %914 = vsyncpa [#allocation16], 1 }

</bundles_post_ra>
